<compile_context>
chip_gen: v7x
topology: tpu7x:2x2x1
jax: 0.10.0
libtpu: 0.0.40
codegen_flags: <defaults>
</compile_context>

<pallas_src>
import functools
import numpy as np
import jax
import jax.numpy as jnp
from jax.experimental import pallas as pl
from jax.experimental.pallas import tpu as pltpu


# ----------------------------------------------------------------------------
# Fused InvertedResidual kernel (one grid step per batch element).
# Ref order: x, [w1, s1, b1 if expand], kdw, b2, w3t, s3, b3, [x_res], out, pad
# ----------------------------------------------------------------------------
def _ir_kernel(*refs, H, W, stride, do_expand, use_res, strip_rows):
    it = iter(refs)
    x_ref = next(it)
    if do_expand:
        w1_ref = next(it)
        s1_ref = next(it)
        b1_ref = next(it)
    kdw_ref = next(it)       # [3, 3, hidden]   (BN2 scale already folded in)
    b2_ref = next(it)        # [1, hidden]
    w3t_ref = next(it)       # [oup, hidden]    (bf16)
    s3_ref = next(it)        # [oup, 1]
    b3_ref = next(it)        # [oup, 1]
    xres_ref = next(it) if use_res else None
    o_ref = next(it)         # [oup, Ho*Wo]     (channel-major / NCHW)
    pad_ref = next(it)       # [H+2, W+2, hidden] VMEM scratch (f32)

    hidden = pad_ref.shape[-1]
    Ho = (H - 1) // stride + 1
    Wo = (W - 1) // stride + 1
    SH = strip_rows
    n_strips = Ho // SH
    cols_per_strip = SH * Wo

    # ---- stage 1: 1x1 expansion conv + BN + ReLU6 (skipped if expand_ratio==1)
    if do_expand:
        h = jnp.dot(x_ref[...], w1_ref[...],
                    preferred_element_type=jnp.float32)          # [H*W, hidden]
        h = jnp.clip(h * s1_ref[...] + b1_ref[...], 0.0, 6.0)
    else:
        h = x_ref[...].astype(jnp.float32)                       # [H*W, hidden==inp]

    # Hidden activation goes into a zero-padded VMEM scratch (pad=1) that
    # stays resident for the whole block (no HBM round trip).
    pad_ref[...] = jnp.zeros_like(pad_ref)
    pad_ref[1:H + 1, 1:W + 1, :] = h.reshape(H, W, hidden)

    k = kdw_ref[...]                          # [3, 3, hidden] (f32, scale folded)
    b2 = b2_ref[...]                          # [1, hidden]
    w3t = w3t_ref[...]                        # [oup, hidden] bf16
    s3 = s3_ref[...]                          # [oup, 1]
    b3 = b3_ref[...]

    def strip_body(s, carry):
        r0 = s * SH                           # first output row of this strip

        # ---- stage 2: depthwise 3x3 + BN + ReLU6 on an output-row strip (f32 VPU).
        if stride == 1:
            acc = jnp.zeros((SH, W, hidden), jnp.float32)
            for dh in range(3):
                rows = pl.ds(r0 + dh, SH)
                for dw in range(3):
                    win = pad_ref[rows, pl.ds(dw, W), :]          # [SH, W, hidden]
                    acc = acc + win * k[dh, dw, :]
        else:
            # stride-2: compute directly at output resolution via strided reads
            # (rows over the outer dim, columns over the sublane dim).
            acc = jnp.zeros((SH, Wo, hidden), jnp.float32)
            for dh in range(3):
                rows = pl.ds(2 * r0 + dh, SH, 2)
                for dw in range(3):
                    win = pad_ref[rows, pl.ds(dw, Wo, 2), :]      # [SH, Wo, hidden]
                    acc = acc + win * k[dh, dw, :]
        y = jnp.clip(acc + b2, 0.0, 6.0)                          # [SH, Wo, hidden]
        y2 = y.reshape(SH * Wo, hidden)

        # ---- stage 3: 1x1 projection conv + BN, produced channel-major so the
        #      stored last dim (SH*Wo) is lane-dense.
        out = jax.lax.dot_general(
            w3t, y2.astype(jnp.bfloat16),
            dimension_numbers=(((1,), (1,)), ((), ())),
            preferred_element_type=jnp.float32)                   # [oup, SH*Wo]
        out = out * s3 + b3

        col0 = pl.multiple_of(r0 * Wo, cols_per_strip)
        if use_res:
            out = out + xres_ref[:, pl.ds(col0, cols_per_strip)]
        o_ref[:, pl.ds(col0, cols_per_strip)] = out.astype(o_ref.dtype)
        return carry

    jax.lax.fori_loop(0, n_strips, strip_body, 0, unroll=True)


# ----------------------------------------------------------------------------
# BN folding + parameter setup (deterministic, synthetic).
# ----------------------------------------------------------------------------
def _fold_bn(gamma, beta, mean, var, eps=1e-5):
    scale = gamma / jnp.sqrt(var + eps)
    bias = beta - mean * scale
    return scale, bias


def init_params(key, inp, oup, expand_ratio):
    hidden = int(inp * expand_ratio)
    ks = jax.random.split(key, 12)
    p = {}
    if expand_ratio != 1:
        p["w1"] = 0.2 * jax.random.normal(ks[0], (inp, hidden), jnp.float32)
        p["bn1"] = (1.0 + 0.1 * jax.random.normal(ks[1], (hidden,), jnp.float32),
                    0.1 * jax.random.normal(ks[2], (hidden,), jnp.float32),
                    0.05 * jax.random.normal(ks[3], (hidden,), jnp.float32),
                    jax.random.uniform(ks[4], (hidden,), jnp.float32, 0.5, 1.5))
    p["kdw"] = 0.2 * jax.random.normal(ks[5], (3, 3, hidden), jnp.float32)
    p["bn2"] = (1.0 + 0.1 * jax.random.normal(ks[6], (hidden,), jnp.float32),
                0.1 * jax.random.normal(ks[7], (hidden,), jnp.float32),
                0.05 * jax.random.normal(ks[8], (hidden,), jnp.float32),
                jax.random.uniform(ks[9], (hidden,), jnp.float32, 0.5, 1.5))
    p["w3"] = 0.2 * jax.random.normal(ks[10], (hidden, oup), jnp.float32)
    p["bn3"] = (1.0 + 0.1 * jax.random.normal(ks[11], (oup,), jnp.float32),
                0.1 * jnp.ones((oup,), jnp.float32),
                0.05 * jnp.ones((oup,), jnp.float32),
                jnp.ones((oup,), jnp.float32))
    return p


# ----------------------------------------------------------------------------
# Forward pass: one fused pallas_call over the batch.
# ----------------------------------------------------------------------------
def inverted_residual_forward(x_nchw, params, *, inp, oup, stride, expand_ratio):
    assert stride in (1, 2)
    N, c_in, H, W = x_nchw.shape
    assert c_in == inp
    if stride == 2:
        assert H % 2 == 0 and W % 2 == 0, "stride-2 path assumes even spatial dims"

    use_res = (stride == 1) and (inp == oup)
    do_expand = (expand_ratio != 1)
    hidden = int(inp * expand_ratio)

    x = x_nchw.astype(jnp.float32)
    HW = H * W
    Ho = (H - 1) // stride + 1
    Wo = (W - 1) // stride + 1
    HoWo = Ho * Wo

    # NHWC-flattened view for the expansion matmul (spatial rows, channel lanes).
    x_nhwc = jnp.transpose(x, (0, 2, 3, 1)).reshape(N, HW, inp)
    if do_expand:
        # matmul operand only -> bf16 (halves DMA; MXU accumulates in f32)
        x_nhwc = x_nhwc.astype(jnp.bfloat16)

    s2, b2 = _fold_bn(*params["bn2"])
    kdw = params["kdw"] * s2                           # fold BN2 scale into DW taps
    s3, b3 = _fold_bn(*params["bn3"])
    w3t = jnp.transpose(params["w3"]).astype(jnp.bfloat16)   # [oup, hidden]

    SH = 8 if (Ho % 8 == 0) else Ho                    # output-row strip height

    in_specs = [pl.BlockSpec((None, HW, inp), lambda n: (n, 0, 0))]
    args = [x_nhwc]
    if do_expand:
        s1, b1 = _fold_bn(*params["bn1"])
        in_specs += [pl.BlockSpec((inp, hidden), lambda n: (0, 0)),
                     pl.BlockSpec((1, hidden), lambda n: (0, 0)),
                     pl.BlockSpec((1, hidden), lambda n: (0, 0))]
        args += [params["w1"].astype(jnp.bfloat16),
                 s1.reshape(1, hidden), b1.reshape(1, hidden)]
    in_specs += [pl.BlockSpec((3, 3, hidden), lambda n: (0, 0, 0)),
                 pl.BlockSpec((1, hidden), lambda n: (0, 0)),
                 pl.BlockSpec((oup, hidden), lambda n: (0, 0)),
                 pl.BlockSpec((oup, 1), lambda n: (0, 0)),
                 pl.BlockSpec((oup, 1), lambda n: (0, 0))]
    args += [kdw, b2.reshape(1, hidden), w3t,
             s3.reshape(oup, 1), b3.reshape(oup, 1)]
    if use_res:
        # channel-major (NCHW) view of x for the in-kernel residual add (f32)
        x_cm = x.reshape(N, inp, HW)
        in_specs.append(pl.BlockSpec((None, oup, HW), lambda n: (n, 0, 0)))
        args.append(x_cm)

    kernel = functools.partial(
        _ir_kernel, H=H, W=W, stride=stride,
        do_expand=do_expand, use_res=use_res, strip_rows=SH)

    out_cm = pl.pallas_call(
        kernel,
        out_shape=jax.ShapeDtypeStruct((N, oup, HoWo), jnp.float32),
        grid=(N,),
        in_specs=in_specs,
        out_specs=pl.BlockSpec((None, oup, HoWo), lambda n: (n, 0, 0)),
        scratch_shapes=[pltpu.VMEM((H + 2, W + 2, hidden), jnp.float32)],
        compiler_params=pltpu.CompilerParams(
            dimension_semantics=("parallel",)),
    )(*args)

    # Output is already channel-major -> NCHW, no transpose needed.
    return out_cm.reshape(N, oup, Ho, Wo)


# ----------------------------------------------------------------------------
# Pure-JAX reference (same eval-mode BN folding, same bf16 matmul precision).
# ----------------------------------------------------------------------------
def reference_forward(x_nchw, params, *, inp, oup, stride, expand_ratio):
    use_res = (stride == 1) and (inp == oup)
    x = jnp.transpose(x_nchw, (0, 2, 3, 1)).astype(jnp.float32)   # NHWC
    y = x
    if expand_ratio != 1:
        s1, b1 = _fold_bn(*params["bn1"])
        y = jnp.einsum("nhwc,cd->nhwd",
                       y.astype(jnp.bfloat16), params["w1"].astype(jnp.bfloat16),
                       preferred_element_type=jnp.float32)
        y = jnp.clip(y * s1 + b1, 0.0, 6.0)

    N, H, W, C = y.shape
    Ho = (H - 1) // stride + 1
    Wo = (W - 1) // stride + 1
    s2, b2 = _fold_bn(*params["bn2"])
    yp = jnp.pad(y, ((0, 0), (1, 1), (1, 1), (0, 0)))
    acc = jnp.zeros((N, Ho, Wo, C), jnp.float32)
    for dh in range(3):
        for dw in range(3):
            win = yp[:, dh:dh + stride * (Ho - 1) + 1:stride,
                        dw:dw + stride * (Wo - 1) + 1:stride, :]
            acc = acc + win * params["kdw"][dh, dw, :]
    y = jnp.clip(acc * s2 + b2, 0.0, 6.0)

    s3, b3 = _fold_bn(*params["bn3"])
    out = jnp.einsum("nhwc,cd->nhwd",
                     y.astype(jnp.bfloat16), params["w3"].astype(jnp.bfloat16),
                     preferred_element_type=jnp.float32)
    out = out * s3 + b3
    if use_res:
        out = out + x
    return jnp.transpose(out, (0, 3, 1, 2))


if __name__ == "__main__":
    key = jax.random.PRNGKey(0)
    kx, kp, kp2 = jax.random.split(key, 3)

    # Config 1: InvertedResidual(inp=4, oup=4, stride=1, expand_ratio=6)
    #           -> hidden_dim=24, use_res_connect=True.
    inp, oup, stride, expand_ratio = 4, 4, 1, 6
    x = jax.random.normal(kx, (2, inp, 16, 16), jnp.float32)     # NCHW like PyTorch
    params = init_params(kp, inp, oup, expand_ratio)

    out = jax.block_until_ready(
        inverted_residual_forward(x, params, inp=inp, oup=oup,
                                  stride=stride, expand_ratio=expand_ratio))
    ref = jax.block_until_ready(
        reference_forward(x, params, inp=inp, oup=oup,
                          stride=stride, expand_ratio=expand_ratio))
    assert out.shape == (2, oup, 16, 16)
    np.testing.assert_allclose(np.asarray(out), np.asarray(ref), atol=5e-3, rtol=5e-3)

    # Config 2: expand_ratio=1 (no expansion conv), inp != oup (no residual).
    inp2, oup2, stride2, er2 = 4, 8, 1, 1
    params2 = init_params(kp2, inp2, oup2, er2)
    out2 = jax.block_until_ready(
        inverted_residual_forward(x, params2, inp=inp2, oup=oup2,
                                  stride=stride2, expand_ratio=er2))
    ref2 = jax.block_until_ready(
        reference_forward(x, params2, inp=inp2, oup=oup2,
                          stride=stride2, expand_ratio=er2))
    assert out2.shape == (2, oup2, 16, 16)
    np.testing.assert_allclose(np.asarray(out2), np.asarray(ref2), atol=5e-3, rtol=5e-3)

    print("KERNEL_OK")
</pallas_src>

<mosaic_0001>
module attributes {stable_mosaic.version = 11 : i64} {
  func.func @_ir_kernel(%arg0: i32, %arg1: memref<1x256x4xbf16, #tpu.memory_space<vmem>>, %arg2: memref<4x24xbf16, #tpu.memory_space<vmem>>, %arg3: memref<1x24xf32, #tpu.memory_space<vmem>>, %arg4: memref<1x24xf32, #tpu.memory_space<vmem>>, %arg5: memref<3x3x24xf32, #tpu.memory_space<vmem>>, %arg6: memref<1x24xf32, #tpu.memory_space<vmem>>, %arg7: memref<4x24xbf16, #tpu.memory_space<vmem>>, %arg8: memref<4x1xf32, #tpu.memory_space<vmem>>, %arg9: memref<4x1xf32, #tpu.memory_space<vmem>>, %arg10: memref<1x4x256xf32, #tpu.memory_space<vmem>>, %arg11: memref<1x4x256xf32, #tpu.memory_space<vmem>>, %arg12: memref<18x18x24xf32, #tpu.memory_space<vmem>>) attributes {dimension_semantics = [#tpu.dimension_semantics<parallel>], iteration_bounds = array<i64: 2>, scalar_prefetch = 0 : i64, scratch_operands = 1 : i64, tpu.core_type = #tpu.core_type<tc>, window_params = [{transform_indices = @transform_0, window_bounds = array<i64: 1, 256, 4>}, {pipeline_mode = #tpu.pipeline_mode<synchronous>, transform_indices = @transform_1, window_bounds = array<i64: 4, 24>}, {pipeline_mode = #tpu.pipeline_mode<synchronous>, transform_indices = @transform_2, window_bounds = array<i64: 1, 24>}, {pipeline_mode = #tpu.pipeline_mode<synchronous>, transform_indices = @transform_3, window_bounds = array<i64: 1, 24>}, {pipeline_mode = #tpu.pipeline_mode<synchronous>, transform_indices = @transform_4, window_bounds = array<i64: 3, 3, 24>}, {pipeline_mode = #tpu.pipeline_mode<synchronous>, transform_indices = @transform_5, window_bounds = array<i64: 1, 24>}, {pipeline_mode = #tpu.pipeline_mode<synchronous>, transform_indices = @transform_6, window_bounds = array<i64: 4, 24>}, {pipeline_mode = #tpu.pipeline_mode<synchronous>, transform_indices = @transform_7, window_bounds = array<i64: 4, 1>}, {pipeline_mode = #tpu.pipeline_mode<synchronous>, transform_indices = @transform_8, window_bounds = array<i64: 4, 1>}, {transform_indices = @transform_9, window_bounds = array<i64: 1, 4, 256>}, {transform_indices = @transform_10, window_bounds = array<i64: 1, 4, 256>}]} {
    %c0 = arith.constant 0 : index
    %c0_0 = arith.constant 0 : index
    %c0_1 = arith.constant 0 : index
    %0 = vector.load %arg1[%c0, %c0_0, %c0_1] : memref<1x256x4xbf16, #tpu.memory_space<vmem>>, vector<1x256x4xbf16>
    %1 = vector.shape_cast %0 : vector<1x256x4xbf16> to vector<256x4xbf16>
    %c0_2 = arith.constant 0 : index
    %c0_3 = arith.constant 0 : index
    %2 = vector.load %arg2[%c0_2, %c0_3] : memref<4x24xbf16, #tpu.memory_space<vmem>>, vector<4x24xbf16>
    %cst = arith.constant dense<0.000000e+00> : vector<256x24xf32>
    %3 = tpu.matmul %1, %2, %cst {dimension_numbers = #tpu.dot_dimension_numbers<[1], [0], [0], [1], [0, 0, 1, 1], [], []>} : vector<256x4xbf16>, vector<4x24xbf16>, vector<256x24xf32> -> vector<256x24xf32>
    %c0_4 = arith.constant 0 : index
    %c0_5 = arith.constant 0 : index
    %4 = vector.load %arg3[%c0_4, %c0_5] : memref<1x24xf32, #tpu.memory_space<vmem>>, vector<1x24xf32>
    %5 = vector.broadcast %4 : vector<1x24xf32> to vector<256x24xf32>
    %6 = arith.mulf %3, %5 : vector<256x24xf32>
    %c0_6 = arith.constant 0 : index
    %c0_7 = arith.constant 0 : index
    %7 = vector.load %arg4[%c0_6, %c0_7] : memref<1x24xf32, #tpu.memory_space<vmem>>, vector<1x24xf32>
    %8 = vector.broadcast %7 : vector<1x24xf32> to vector<256x24xf32>
    %9 = arith.addf %6, %8 : vector<256x24xf32>
    %cst_8 = arith.constant 0.000000e+00 : f32
    %cst_9 = arith.constant 6.000000e+00 : f32
    %10 = vector.broadcast %cst_8 : f32 to vector<256x24xf32>
    %11 = arith.maximumf %10, %9 : vector<256x24xf32>
    %12 = vector.broadcast %cst_9 : f32 to vector<256x24xf32>
    %13 = arith.minimumf %12, %11 : vector<256x24xf32>
    %cst_10 = arith.constant 0.000000e+00 : f32
    %14 = vector.broadcast %cst_10 : f32 to vector<18x18x24xf32>
    %c0_11 = arith.constant 0 : index
    %c0_12 = arith.constant 0 : index
    %c0_13 = arith.constant 0 : index
    %15 = vector.load %arg12[%c0_11, %c0_12, %c0_13] : memref<18x18x24xf32, #tpu.memory_space<vmem>>, vector<18x18x24xf32>
    tpu.vector_store %arg12[%c0_11, %c0_12, %c0_13], %14 {strides = array<i32>} : memref<18x18x24xf32, #tpu.memory_space<vmem>>, vector<18x18x24xf32>,
    %16 = vector.shape_cast %13 : vector<256x24xf32> to vector<16x16x24xf32>
    %c1 = arith.constant 1 : index
    %c1_14 = arith.constant 1 : index
    %c0_15 = arith.constant 0 : index
    %17 = vector.load %arg12[%c1, %c1_14, %c0_15] : memref<18x18x24xf32, #tpu.memory_space<vmem>>, vector<16x16x24xf32>
    tpu.vector_store %arg12[%c1, %c1_14, %c0_15], %16 {strides = array<i32>} : memref<18x18x24xf32, #tpu.memory_space<vmem>>, vector<16x16x24xf32>,
    %c0_16 = arith.constant 0 : index
    %c0_17 = arith.constant 0 : index
    %c0_18 = arith.constant 0 : index
    %18 = vector.load %arg5[%c0_16, %c0_17, %c0_18] : memref<3x3x24xf32, #tpu.memory_space<vmem>>, vector<3x3x24xf32>
    %c0_19 = arith.constant 0 : index
    %c0_20 = arith.constant 0 : index
    %19 = vector.load %arg6[%c0_19, %c0_20] : memref<1x24xf32, #tpu.memory_space<vmem>>, vector<1x24xf32>
    %c0_21 = arith.constant 0 : index
    %c0_22 = arith.constant 0 : index
    %20 = vector.load %arg7[%c0_21, %c0_22] : memref<4x24xbf16, #tpu.memory_space<vmem>>, vector<4x24xbf16>
    %c0_23 = arith.constant 0 : index
    %c0_24 = arith.constant 0 : index
    %21 = vector.load %arg8[%c0_23, %c0_24] : memref<4x1xf32, #tpu.memory_space<vmem>>, vector<4x1xf32>
    %c0_25 = arith.constant 0 : index
    %c0_26 = arith.constant 0 : index
    %22 = vector.load %arg9[%c0_25, %c0_26] : memref<4x1xf32, #tpu.memory_space<vmem>>, vector<4x1xf32>
    %c0_i32 = arith.constant 0 : i32
    %c8_i32 = arith.constant 8 : i32
    %23 = arith.muli %c0_i32, %c8_i32 : i32
    %cst_27 = arith.constant 0.000000e+00 : f32
    %24 = vector.broadcast %cst_27 : f32 to vector<8x16x24xf32>
    %c0_i32_28 = arith.constant 0 : i32
    %25 = arith.addi %23, %c0_i32_28 : i32
    %26 = arith.index_cast %25 : i32 to index
    %c0_29 = arith.constant 0 : index
    %c0_30 = arith.constant 0 : index
    %27 = vector.load %arg12[%26, %c0_29, %c0_30] : memref<18x18x24xf32, #tpu.memory_space<vmem>>, vector<8x16x24xf32>
    %28 = vector.extract_strided_slice %18 {offsets = [0, 0, 0], sizes = [1, 1, 24], strides = [1, 1, 1]} : vector<3x3x24xf32> to vector<1x1x24xf32>
    %29 = vector.shape_cast %28 : vector<1x1x24xf32> to vector<24xf32>
    %30 = vector.shape_cast %29 : vector<24xf32> to vector<1x1x24xf32>
    %31 = vector.broadcast %30 : vector<1x1x24xf32> to vector<8x16x24xf32>
    %32 = arith.mulf %27, %31 : vector<8x16x24xf32>
    %33 = arith.addf %24, %32 : vector<8x16x24xf32>
    %34 = arith.index_cast %25 : i32 to index
    %c1_31 = arith.constant 1 : index
    %c0_32 = arith.constant 0 : index
    %35 = vector.load %arg12[%34, %c1_31, %c0_32] : memref<18x18x24xf32, #tpu.memory_space<vmem>>, vector<8x16x24xf32>
    %36 = vector.extract_strided_slice %18 {offsets = [0, 1, 0], sizes = [1, 1, 24], strides = [1, 1, 1]} : vector<3x3x24xf32> to vector<1x1x24xf32>
    %37 = vector.shape_cast %36 : vector<1x1x24xf32> to vector<24xf32>
    %38 = vector.shape_cast %37 : vector<24xf32> to vector<1x1x24xf32>
    %39 = vector.broadcast %38 : vector<1x1x24xf32> to vector<8x16x24xf32>
    %40 = arith.mulf %35, %39 : vector<8x16x24xf32>
    %41 = arith.addf %33, %40 : vector<8x16x24xf32>
    %42 = arith.index_cast %25 : i32 to index
    %c2 = arith.constant 2 : index
    %c0_33 = arith.constant 0 : index
    %43 = vector.load %arg12[%42, %c2, %c0_33] : memref<18x18x24xf32, #tpu.memory_space<vmem>>, vector<8x16x24xf32>
    %44 = vector.extract_strided_slice %18 {offsets = [0, 2, 0], sizes = [1, 1, 24], strides = [1, 1, 1]} : vector<3x3x24xf32> to vector<1x1x24xf32>
    %45 = vector.shape_cast %44 : vector<1x1x24xf32> to vector<24xf32>
    %46 = vector.shape_cast %45 : vector<24xf32> to vector<1x1x24xf32>
    %47 = vector.broadcast %46 : vector<1x1x24xf32> to vector<8x16x24xf32>
    %48 = arith.mulf %43, %47 : vector<8x16x24xf32>
    %49 = arith.addf %41, %48 : vector<8x16x24xf32>
    %c1_i32 = arith.constant 1 : i32
    %50 = arith.addi %23, %c1_i32 : i32
    %51 = arith.index_cast %50 : i32 to index
    %c0_34 = arith.constant 0 : index
    %c0_35 = arith.constant 0 : index
    %52 = vector.load %arg12[%51, %c0_34, %c0_35] : memref<18x18x24xf32, #tpu.memory_space<vmem>>, vector<8x16x24xf32>
    %53 = vector.extract_strided_slice %18 {offsets = [1, 0, 0], sizes = [1, 1, 24], strides = [1, 1, 1]} : vector<3x3x24xf32> to vector<1x1x24xf32>
    %54 = vector.shape_cast %53 : vector<1x1x24xf32> to vector<24xf32>
    %55 = vector.shape_cast %54 : vector<24xf32> to vector<1x1x24xf32>
    %56 = vector.broadcast %55 : vector<1x1x24xf32> to vector<8x16x24xf32>
    %57 = arith.mulf %52, %56 : vector<8x16x24xf32>
    %58 = arith.addf %49, %57 : vector<8x16x24xf32>
    %59 = arith.index_cast %50 : i32 to index
    %c1_36 = arith.constant 1 : index
    %c0_37 = arith.constant 0 : index
    %60 = vector.load %arg12[%59, %c1_36, %c0_37] : memref<18x18x24xf32, #tpu.memory_space<vmem>>, vector<8x16x24xf32>
    %61 = vector.extract_strided_slice %18 {offsets = [1, 1, 0], sizes = [1, 1, 24], strides = [1, 1, 1]} : vector<3x3x24xf32> to vector<1x1x24xf32>
    %62 = vector.shape_cast %61 : vector<1x1x24xf32> to vector<24xf32>
    %63 = vector.shape_cast %62 : vector<24xf32> to vector<1x1x24xf32>
    %64 = vector.broadcast %63 : vector<1x1x24xf32> to vector<8x16x24xf32>
    %65 = arith.mulf %60, %64 : vector<8x16x24xf32>
    %66 = arith.addf %58, %65 : vector<8x16x24xf32>
    %67 = arith.index_cast %50 : i32 to index
    %c2_38 = arith.constant 2 : index
    %c0_39 = arith.constant 0 : index
    %68 = vector.load %arg12[%67, %c2_38, %c0_39] : memref<18x18x24xf32, #tpu.memory_space<vmem>>, vector<8x16x24xf32>
    %69 = vector.extract_strided_slice %18 {offsets = [1, 2, 0], sizes = [1, 1, 24], strides = [1, 1, 1]} : vector<3x3x24xf32> to vector<1x1x24xf32>
    %70 = vector.shape_cast %69 : vector<1x1x24xf32> to vector<24xf32>
    %71 = vector.shape_cast %70 : vector<24xf32> to vector<1x1x24xf32>
    %72 = vector.broadcast %71 : vector<1x1x24xf32> to vector<8x16x24xf32>
    %73 = arith.mulf %68, %72 : vector<8x16x24xf32>
    %74 = arith.addf %66, %73 : vector<8x16x24xf32>
    %c2_i32 = arith.constant 2 : i32
    %75 = arith.addi %23, %c2_i32 : i32
    %76 = arith.index_cast %75 : i32 to index
    %c0_40 = arith.constant 0 : index
    %c0_41 = arith.constant 0 : index
    %77 = vector.load %arg12[%76, %c0_40, %c0_41] : memref<18x18x24xf32, #tpu.memory_space<vmem>>, vector<8x16x24xf32>
    %78 = vector.extract_strided_slice %18 {offsets = [2, 0, 0], sizes = [1, 1, 24], strides = [1, 1, 1]} : vector<3x3x24xf32> to vector<1x1x24xf32>
    %79 = vector.shape_cast %78 : vector<1x1x24xf32> to vector<24xf32>
    %80 = vector.shape_cast %79 : vector<24xf32> to vector<1x1x24xf32>
    %81 = vector.broadcast %80 : vector<1x1x24xf32> to vector<8x16x24xf32>
    %82 = arith.mulf %77, %81 : vector<8x16x24xf32>
    %83 = arith.addf %74, %82 : vector<8x16x24xf32>
    %84 = arith.index_cast %75 : i32 to index
    %c1_42 = arith.constant 1 : index
    %c0_43 = arith.constant 0 : index
    %85 = vector.load %arg12[%84, %c1_42, %c0_43] : memref<18x18x24xf32, #tpu.memory_space<vmem>>, vector<8x16x24xf32>
    %86 = vector.extract_strided_slice %18 {offsets = [2, 1, 0], sizes = [1, 1, 24], strides = [1, 1, 1]} : vector<3x3x24xf32> to vector<1x1x24xf32>
    %87 = vector.shape_cast %86 : vector<1x1x24xf32> to vector<24xf32>
    %88 = vector.shape_cast %87 : vector<24xf32> to vector<1x1x24xf32>
    %89 = vector.broadcast %88 : vector<1x1x24xf32> to vector<8x16x24xf32>
    %90 = arith.mulf %85, %89 : vector<8x16x24xf32>
    %91 = arith.addf %83, %90 : vector<8x16x24xf32>
    %92 = arith.index_cast %75 : i32 to index
    %c2_44 = arith.constant 2 : index
    %c0_45 = arith.constant 0 : index
    %93 = vector.load %arg12[%92, %c2_44, %c0_45] : memref<18x18x24xf32, #tpu.memory_space<vmem>>, vector<8x16x24xf32>
    %94 = vector.extract_strided_slice %18 {offsets = [2, 2, 0], sizes = [1, 1, 24], strides = [1, 1, 1]} : vector<3x3x24xf32> to vector<1x1x24xf32>
    %95 = vector.shape_cast %94 : vector<1x1x24xf32> to vector<24xf32>
    %96 = vector.shape_cast %95 : vector<24xf32> to vector<1x1x24xf32>
    %97 = vector.broadcast %96 : vector<1x1x24xf32> to vector<8x16x24xf32>
    %98 = arith.mulf %93, %97 : vector<8x16x24xf32>
    %99 = arith.addf %91, %98 : vector<8x16x24xf32>
    %100 = vector.shape_cast %19 : vector<1x24xf32> to vector<1x1x24xf32>
    %101 = vector.broadcast %100 : vector<1x1x24xf32> to vector<8x16x24xf32>
    %102 = arith.addf %99, %101 : vector<8x16x24xf32>
    %cst_46 = arith.constant 0.000000e+00 : f32
    %cst_47 = arith.constant 6.000000e+00 : f32
    %103 = vector.broadcast %cst_46 : f32 to vector<8x16x24xf32>
    %104 = arith.maximumf %103, %102 : vector<8x16x24xf32>
    %105 = vector.broadcast %cst_47 : f32 to vector<8x16x24xf32>
    %106 = arith.minimumf %105, %104 : vector<8x16x24xf32>
    %107 = vector.shape_cast %106 : vector<8x16x24xf32> to vector<128x24xf32>
    %108 = arith.truncf %107 : vector<128x24xf32> to vector<128x24xbf16>
    %cst_48 = arith.constant dense<0.000000e+00> : vector<4x128xf32>
    %109 = tpu.matmul %20, %108, %cst_48 {dimension_numbers = #tpu.dot_dimension_numbers<[1], [1], [0], [0], [0, 0, 1, 0], [], []>} : vector<4x24xbf16>, vector<128x24xbf16>, vector<4x128xf32> -> vector<4x128xf32>
    %110 = vector.broadcast %21 : vector<4x1xf32> to vector<4x128xf32>
    %111 = arith.mulf %109, %110 : vector<4x128xf32>
    %112 = vector.broadcast %22 : vector<4x1xf32> to vector<4x128xf32>
    %113 = arith.addf %111, %112 : vector<4x128xf32>
    %c16_i32 = arith.constant 16 : i32
    %114 = arith.muli %23, %c16_i32 : i32
    %115 = tpu.assume_multiple %114, 128 : i32
    %c0_49 = arith.constant 0 : index
    %c0_50 = arith.constant 0 : index
    %116 = arith.index_cast %115 : i32 to index
    %117 = vector.load %arg10[%c0_49, %c0_50, %116] : memref<1x4x256xf32, #tpu.memory_space<vmem>>, vector<1x4x128xf32>
    %118 = vector.shape_cast %117 : vector<1x4x128xf32> to vector<4x128xf32>
    %119 = arith.addf %113, %118 : vector<4x128xf32>
    %c0_51 = arith.constant 0 : index
    %c0_52 = arith.constant 0 : index
    %120 = arith.index_cast %115 : i32 to index
    %121 = vector.load %arg11[%c0_51, %c0_52, %120] : memref<1x4x256xf32, #tpu.memory_space<vmem>>, vector<1x4x128xf32>
    %122 = vector.shape_cast %121 : vector<1x4x128xf32> to vector<4x128xf32>
    %123 = vector.shape_cast %119 : vector<4x128xf32> to vector<1x4x128xf32>
    tpu.vector_store %arg11[%c0_51, %c0_52, %120], %123 {strides = array<i32>} : memref<1x4x256xf32, #tpu.memory_space<vmem>>, vector<1x4x128xf32>,
    %c1_i32_53 = arith.constant 1 : i32
    %c8_i32_54 = arith.constant 8 : i32
    %124 = arith.muli %c1_i32_53, %c8_i32_54 : i32
    %cst_55 = arith.constant 0.000000e+00 : f32
    %125 = vector.broadcast %cst_55 : f32 to vector<8x16x24xf32>
    %c0_i32_56 = arith.constant 0 : i32
    %126 = arith.addi %124, %c0_i32_56 : i32
    %127 = arith.index_cast %126 : i32 to index
    %c0_57 = arith.constant 0 : index
    %c0_58 = arith.constant 0 : index
    %128 = vector.load %arg12[%127, %c0_57, %c0_58] : memref<18x18x24xf32, #tpu.memory_space<vmem>>, vector<8x16x24xf32>
    %129 = vector.extract_strided_slice %18 {offsets = [0, 0, 0], sizes = [1, 1, 24], strides = [1, 1, 1]} : vector<3x3x24xf32> to vector<1x1x24xf32>
    %130 = vector.shape_cast %129 : vector<1x1x24xf32> to vector<24xf32>
    %131 = vector.shape_cast %130 : vector<24xf32> to vector<1x1x24xf32>
    %132 = vector.broadcast %131 : vector<1x1x24xf32> to vector<8x16x24xf32>
    %133 = arith.mulf %128, %132 : vector<8x16x24xf32>
    %134 = arith.addf %125, %133 : vector<8x16x24xf32>
    %135 = arith.index_cast %126 : i32 to index
    %c1_59 = arith.constant 1 : index
    %c0_60 = arith.constant 0 : index
    %136 = vector.load %arg12[%135, %c1_59, %c0_60] : memref<18x18x24xf32, #tpu.memory_space<vmem>>, vector<8x16x24xf32>
    %137 = vector.extract_strided_slice %18 {offsets = [0, 1, 0], sizes = [1, 1, 24], strides = [1, 1, 1]} : vector<3x3x24xf32> to vector<1x1x24xf32>
    %138 = vector.shape_cast %137 : vector<1x1x24xf32> to vector<24xf32>
    %139 = vector.shape_cast %138 : vector<24xf32> to vector<1x1x24xf32>
    %140 = vector.broadcast %139 : vector<1x1x24xf32> to vector<8x16x24xf32>
    %141 = arith.mulf %136, %140 : vector<8x16x24xf32>
    %142 = arith.addf %134, %141 : vector<8x16x24xf32>
    %143 = arith.index_cast %126 : i32 to index
    %c2_61 = arith.constant 2 : index
    %c0_62 = arith.constant 0 : index
    %144 = vector.load %arg12[%143, %c2_61, %c0_62] : memref<18x18x24xf32, #tpu.memory_space<vmem>>, vector<8x16x24xf32>
    %145 = vector.extract_strided_slice %18 {offsets = [0, 2, 0], sizes = [1, 1, 24], strides = [1, 1, 1]} : vector<3x3x24xf32> to vector<1x1x24xf32>
    %146 = vector.shape_cast %145 : vector<1x1x24xf32> to vector<24xf32>
    %147 = vector.shape_cast %146 : vector<24xf32> to vector<1x1x24xf32>
    %148 = vector.broadcast %147 : vector<1x1x24xf32> to vector<8x16x24xf32>
    %149 = arith.mulf %144, %148 : vector<8x16x24xf32>
    %150 = arith.addf %142, %149 : vector<8x16x24xf32>
    %c1_i32_63 = arith.constant 1 : i32
    %151 = arith.addi %124, %c1_i32_63 : i32
    %152 = arith.index_cast %151 : i32 to index
    %c0_64 = arith.constant 0 : index
    %c0_65 = arith.constant 0 : index
    %153 = vector.load %arg12[%152, %c0_64, %c0_65] : memref<18x18x24xf32, #tpu.memory_space<vmem>>, vector<8x16x24xf32>
    %154 = vector.extract_strided_slice %18 {offsets = [1, 0, 0], sizes = [1, 1, 24], strides = [1, 1, 1]} : vector<3x3x24xf32> to vector<1x1x24xf32>
    %155 = vector.shape_cast %154 : vector<1x1x24xf32> to vector<24xf32>
    %156 = vector.shape_cast %155 : vector<24xf32> to vector<1x1x24xf32>
    %157 = vector.broadcast %156 : vector<1x1x24xf32> to vector<8x16x24xf32>
    %158 = arith.mulf %153, %157 : vector<8x16x24xf32>
    %159 = arith.addf %150, %158 : vector<8x16x24xf32>
    %160 = arith.index_cast %151 : i32 to index
    %c1_66 = arith.constant 1 : index
    %c0_67 = arith.constant 0 : index
    %161 = vector.load %arg12[%160, %c1_66, %c0_67] : memref<18x18x24xf32, #tpu.memory_space<vmem>>, vector<8x16x24xf32>
    %162 = vector.extract_strided_slice %18 {offsets = [1, 1, 0], sizes = [1, 1, 24], strides = [1, 1, 1]} : vector<3x3x24xf32> to vector<1x1x24xf32>
    %163 = vector.shape_cast %162 : vector<1x1x24xf32> to vector<24xf32>
    %164 = vector.shape_cast %163 : vector<24xf32> to vector<1x1x24xf32>
    %165 = vector.broadcast %164 : vector<1x1x24xf32> to vector<8x16x24xf32>
    %166 = arith.mulf %161, %165 : vector<8x16x24xf32>
    %167 = arith.addf %159, %166 : vector<8x16x24xf32>
    %168 = arith.index_cast %151 : i32 to index
    %c2_68 = arith.constant 2 : index
    %c0_69 = arith.constant 0 : index
    %169 = vector.load %arg12[%168, %c2_68, %c0_69] : memref<18x18x24xf32, #tpu.memory_space<vmem>>, vector<8x16x24xf32>
    %170 = vector.extract_strided_slice %18 {offsets = [1, 2, 0], sizes = [1, 1, 24], strides = [1, 1, 1]} : vector<3x3x24xf32> to vector<1x1x24xf32>
    %171 = vector.shape_cast %170 : vector<1x1x24xf32> to vector<24xf32>
    %172 = vector.shape_cast %171 : vector<24xf32> to vector<1x1x24xf32>
    %173 = vector.broadcast %172 : vector<1x1x24xf32> to vector<8x16x24xf32>
    %174 = arith.mulf %169, %173 : vector<8x16x24xf32>
    %175 = arith.addf %167, %174 : vector<8x16x24xf32>
    %c2_i32_70 = arith.constant 2 : i32
    %176 = arith.addi %124, %c2_i32_70 : i32
    %177 = arith.index_cast %176 : i32 to index
    %c0_71 = arith.constant 0 : index
    %c0_72 = arith.constant 0 : index
    %178 = vector.load %arg12[%177, %c0_71, %c0_72] : memref<18x18x24xf32, #tpu.memory_space<vmem>>, vector<8x16x24xf32>
    %179 = vector.extract_strided_slice %18 {offsets = [2, 0, 0], sizes = [1, 1, 24], strides = [1, 1, 1]} : vector<3x3x24xf32> to vector<1x1x24xf32>
    %180 = vector.shape_cast %179 : vector<1x1x24xf32> to vector<24xf32>
    %181 = vector.shape_cast %180 : vector<24xf32> to vector<1x1x24xf32>
    %182 = vector.broadcast %181 : vector<1x1x24xf32> to vector<8x16x24xf32>
    %183 = arith.mulf %178, %182 : vector<8x16x24xf32>
    %184 = arith.addf %175, %183 : vector<8x16x24xf32>
    %185 = arith.index_cast %176 : i32 to index
    %c1_73 = arith.constant 1 : index
    %c0_74 = arith.constant 0 : index
    %186 = vector.load %arg12[%185, %c1_73, %c0_74] : memref<18x18x24xf32, #tpu.memory_space<vmem>>, vector<8x16x24xf32>
    %187 = vector.extract_strided_slice %18 {offsets = [2, 1, 0], sizes = [1, 1, 24], strides = [1, 1, 1]} : vector<3x3x24xf32> to vector<1x1x24xf32>
    %188 = vector.shape_cast %187 : vector<1x1x24xf32> to vector<24xf32>
    %189 = vector.shape_cast %188 : vector<24xf32> to vector<1x1x24xf32>
    %190 = vector.broadcast %189 : vector<1x1x24xf32> to vector<8x16x24xf32>
    %191 = arith.mulf %186, %190 : vector<8x16x24xf32>
    %192 = arith.addf %184, %191 : vector<8x16x24xf32>
    %193 = arith.index_cast %176 : i32 to index
    %c2_75 = arith.constant 2 : index
    %c0_76 = arith.constant 0 : index
    %194 = vector.load %arg12[%193, %c2_75, %c0_76] : memref<18x18x24xf32, #tpu.memory_space<vmem>>, vector<8x16x24xf32>
    %195 = vector.extract_strided_slice %18 {offsets = [2, 2, 0], sizes = [1, 1, 24], strides = [1, 1, 1]} : vector<3x3x24xf32> to vector<1x1x24xf32>
    %196 = vector.shape_cast %195 : vector<1x1x24xf32> to vector<24xf32>
    %197 = vector.shape_cast %196 : vector<24xf32> to vector<1x1x24xf32>
    %198 = vector.broadcast %197 : vector<1x1x24xf32> to vector<8x16x24xf32>
    %199 = arith.mulf %194, %198 : vector<8x16x24xf32>
    %200 = arith.addf %192, %199 : vector<8x16x24xf32>
    %201 = vector.shape_cast %19 : vector<1x24xf32> to vector<1x1x24xf32>
    %202 = vector.broadcast %201 : vector<1x1x24xf32> to vector<8x16x24xf32>
    %203 = arith.addf %200, %202 : vector<8x16x24xf32>
    %cst_77 = arith.constant 0.000000e+00 : f32
    %cst_78 = arith.constant 6.000000e+00 : f32
    %204 = vector.broadcast %cst_77 : f32 to vector<8x16x24xf32>
    %205 = arith.maximumf %204, %203 : vector<8x16x24xf32>
    %206 = vector.broadcast %cst_78 : f32 to vector<8x16x24xf32>
    %207 = arith.minimumf %206, %205 : vector<8x16x24xf32>
    %208 = vector.shape_cast %207 : vector<8x16x24xf32> to vector<128x24xf32>
    %209 = arith.truncf %208 : vector<128x24xf32> to vector<128x24xbf16>
    %cst_79 = arith.constant dense<0.000000e+00> : vector<4x128xf32>
    %210 = tpu.matmul %20, %209, %cst_79 {dimension_numbers = #tpu.dot_dimension_numbers<[1], [1], [0], [0], [0, 0, 1, 0], [], []>} : vector<4x24xbf16>, vector<128x24xbf16>, vector<4x128xf32> -> vector<4x128xf32>
    %211 = vector.broadcast %21 : vector<4x1xf32> to vector<4x128xf32>
    %212 = arith.mulf %210, %211 : vector<4x128xf32>
    %213 = vector.broadcast %22 : vector<4x1xf32> to vector<4x128xf32>
    %214 = arith.addf %212, %213 : vector<4x128xf32>
    %c16_i32_80 = arith.constant 16 : i32
    %215 = arith.muli %124, %c16_i32_80 : i32
    %216 = tpu.assume_multiple %215, 128 : i32
    %c0_81 = arith.constant 0 : index
    %c0_82 = arith.constant 0 : index
    %217 = arith.index_cast %216 : i32 to index
    %218 = vector.load %arg10[%c0_81, %c0_82, %217] : memref<1x4x256xf32, #tpu.memory_space<vmem>>, vector<1x4x128xf32>
    %219 = vector.shape_cast %218 : vector<1x4x128xf32> to vector<4x128xf32>
    %220 = arith.addf %214, %219 : vector<4x128xf32>
    %c0_83 = arith.constant 0 : index
    %c0_84 = arith.constant 0 : index
    %221 = arith.index_cast %216 : i32 to index
    %222 = vector.load %arg11[%c0_83, %c0_84, %221] : memref<1x4x256xf32, #tpu.memory_space<vmem>>, vector<1x4x128xf32>
    %223 = vector.shape_cast %222 : vector<1x4x128xf32> to vector<4x128xf32>
    %224 = vector.shape_cast %220 : vector<4x128xf32> to vector<1x4x128xf32>
    tpu.vector_store %arg11[%c0_83, %c0_84, %221], %224 {strides = array<i32>} : memref<1x4x256xf32, #tpu.memory_space<vmem>>, vector<1x4x128xf32>,
    %c2_i32_85 = arith.constant 2 : i32
    return
  }
  func.func @transform_0(%arg0: i32) -> (i32, i32, i32) {
    %c0_i32 = arith.constant 0 : i32
    %c0_i32_0 = arith.constant 0 : i32
    %c0_i32_1 = arith.constant 0 : i32
    return %arg0, %c0_i32, %c0_i32_0 : i32, i32, i32
  }
  func.func @transform_1(%arg0: i32) -> (i32, i32) {
    %c0_i32 = arith.constant 0 : i32
    %c0_i32_0 = arith.constant 0 : i32
    %c0_i32_1 = arith.constant 0 : i32
    return %c0_i32, %c0_i32_0 : i32, i32
  }
  func.func @transform_2(%arg0: i32) -> (i32, i32) {
    %c0_i32 = arith.constant 0 : i32
    %c0_i32_0 = arith.constant 0 : i32
    %c0_i32_1 = arith.constant 0 : i32
    return %c0_i32, %c0_i32_0 : i32, i32
  }
  func.func @transform_3(%arg0: i32) -> (i32, i32) {
    %c0_i32 = arith.constant 0 : i32
    %c0_i32_0 = arith.constant 0 : i32
    %c0_i32_1 = arith.constant 0 : i32
    return %c0_i32, %c0_i32_0 : i32, i32
  }
  func.func @transform_4(%arg0: i32) -> (i32, i32, i32) {
    %c0_i32 = arith.constant 0 : i32
    %c0_i32_0 = arith.constant 0 : i32
    %c0_i32_1 = arith.constant 0 : i32
    %c0_i32_2 = arith.constant 0 : i32
    return %c0_i32, %c0_i32_0, %c0_i32_1 : i32, i32, i32
  }
  func.func @transform_5(%arg0: i32) -> (i32, i32) {
    %c0_i32 = arith.constant 0 : i32
    %c0_i32_0 = arith.constant 0 : i32
    %c0_i32_1 = arith.constant 0 : i32
    return %c0_i32, %c0_i32_0 : i32, i32
  }
  func.func @transform_6(%arg0: i32) -> (i32, i32) {
    %c0_i32 = arith.constant 0 : i32
    %c0_i32_0 = arith.constant 0 : i32
    %c0_i32_1 = arith.constant 0 : i32
    return %c0_i32, %c0_i32_0 : i32, i32
  }
  func.func @transform_7(%arg0: i32) -> (i32, i32) {
    %c0_i32 = arith.constant 0 : i32
    %c0_i32_0 = arith.constant 0 : i32
    %c0_i32_1 = arith.constant 0 : i32
    return %c0_i32, %c0_i32_0 : i32, i32
  }
  func.func @transform_8(%arg0: i32) -> (i32, i32) {
    %c0_i32 = arith.constant 0 : i32
    %c0_i32_0 = arith.constant 0 : i32
    %c0_i32_1 = arith.constant 0 : i32
    return %c0_i32, %c0_i32_0 : i32, i32
  }
  func.func @transform_9(%arg0: i32) -> (i32, i32, i32) {
    %c0_i32 = arith.constant 0 : i32
    %c0_i32_0 = arith.constant 0 : i32
    %c0_i32_1 = arith.constant 0 : i32
    return %arg0, %c0_i32, %c0_i32_0 : i32, i32, i32
  }
  func.func @transform_10(%arg0: i32) -> (i32, i32, i32) {
    %c0_i32 = arith.constant 0 : i32
    %c0_i32_0 = arith.constant 0 : i32
    %c0_i32_1 = arith.constant 0 : i32
    return %arg0, %c0_i32, %c0_i32_0 : i32, i32, i32
  }
}

</mosaic_0001>

<bundles_post_ra>
// kernel: tpu_custom_call.1
= control target key start
LH: loop header
LB: loop body
LE: loop exit
PB: predicated region body
PF: predicated region fallthrough
CT: control target
= control target key end

     0   :  { %15 = vsyncpa [#allocation4], 0  ;;  %s3755_s0 = inlined_call_operand.vmem [shape: bf16[2,256,4], index: 0, kind: input, shape index: {}]   ;;  %s3756_s1 = inlined_call_operand.vmem [shape: bf16[4,24], index: 1, kind: input, shape index: {}]   ;;  %s3757_s2 = inlined_call_operand.vmem [shape: f32[1,24], index: 2, kind: input, shape index: {}]   ;;  %s3758_s3 = inlined_call_operand.vmem [shape: f32[1,24], index: 3, kind: input, shape index: {}]   ;;  %s3759_s4 = inlined_call_operand.vmem [shape: f32[3,3,24], index: 4, kind: input, shape index: {}]   ;;  %s3760_s5 = inlined_call_operand.vmem [shape: f32[1,24], index: 5, kind: input, shape index: {}]   ;;  %s3761_s6 = inlined_call_operand.vmem [shape: bf16[4,24], index: 6, kind: input, shape index: {}]   ;;  %s3762_s7 = inlined_call_operand.vmem [shape: f32[4,1], index: 7, kind: input, shape index: {}]   ;;  %s3763_s8 = inlined_call_operand.vmem [shape: f32[4,1], index: 8, kind: input, shape index: {}]   ;;  %s3764_s9 = inlined_call_operand.vmem [shape: f32[2,4,256], index: 9, kind: input, shape index: {}]   ;;  %s3765_s10 = inlined_call_operand.hbm [shape: f32[2,4,256], index: 10, kind: output, shape index: {}]  }
   0x1   :  { %17 = vsyncpa [#allocation4 + $0x1], 0  ;;  %s2554_s13 = smov 0   ;;  %s2556_s14 = smov 0  }
   0x2   :  { %s2558_s15 = smov 0   ;;  %s2560_s16 = smov 0  }
   0x3 LB: > { %s2575_s17 = sadd.s32 4294967295, %s2493_s16   ;;  %s2205_s18 = sadd.s32 4294967294, %s2493_s16   ;;  %s2493_s16 = sphi %s2560_s16, %s3796_s16   ;;  %s2489_s15 = sphi %s2558_s15, %s3795_s15   ;;  %s2485_s14 = sphi %s2556_s14, %s3794_s14   ;;  %s2481_s13 = sphi %s2554_s13, %s3793_s13  }
   0x4   : > { %s2579_s19 = sadd.s32 1, %s2493_s16   ;;  %s250_s20 = sadd.s32 1, %s2489_s15 }
   0x5   : > { %s247_s21 = ssub.s32 %s2493_s16, %s2579_s19  ;;  %p260_p0 = scmp.ne.s32.totalorder %s2489_s15, %s2485_s14 }
   0x6   : > { %p248_p1 = scmp.eq.s32.totalorder %s247_s21, 0  ;;  %p261_p2 = scmp.eq.s32.totalorder %s2575_s17, 1 }
   0x7   : > { %p266_p3 = scmp.ne.s32.totalorder %s2485_s14, %s2481_s13  ;;  %p267_p4 = scmp.eq.s32.totalorder %s2205_s18, 1 }
   0x8   : > { %s2590_s22 = scalar_select %p248_p1, %s2489_s15, %s250_s20  }
   0x9   : > { %p2592_p5 = por %p261_p2, %p260_p0  ;;  %p2596_p6 = por %p267_p4, %p266_p3 }
   0xa   : > { %p2208_p7 = scmp.ge.s32.totalorder %s2493_s16, 1  ;;  %p325_p8 = scmp.lt.s32.totalorder %s2493_s16, 3 }
   0xc   : > { %p326_p9 = pnand %p2208_p7, %p325_p8 }
   0xe   : > { %329 = sbr.rel (%p326_p9) target bundleno = 699 (0x2bb), region = 60 }
  0x15   : > { %v411_v0 = vld [vmem:[%s3756_s1] sm:$0x3]  ;;  %vm541_vm0 = vcmask 1041408   ;;  %p368_p10 = scmp.lt.s32.totalorder %s2575_s17, 1  ;;  %vm492_vm1 = vcmask 31744   ;;  %vm848_vm2 = vcmask 195584   ;;  %v960_v19 = vlaneseq }
  0x16   : > { %2370 = vmatprep.subr.msk.bf16.mxu0 %vm541_vm0, %v411_v0  ;;  %v543_v1 = vsel %vm541_vm0, %v411_v0, 0  ;;  %v3766_v18 = vmov 0.0   ;;  %vm851_vm3 = vcmask 189440   ;;  %v2760_v21 = vld [vmem:[%s3757_s2] ss:$0 sm:$0xff]  ;;  %vm2496_vm4 = vmmov 0  }
  0x17   : > { %2297 = vmatpush3.bf16.msra.mxu0 %v543_v1  ;;  %s2607_s27 = scalar_select %p368_p10, %s2575_s17, 1  ;;  %856 = vst.msk [vmem:[#allocation2 + $0x30] sm:$0xff] %vm848_vm2, %v3766_v18  ;;  %857 = vst.msk [vmem:[#allocation2 + $0x38] sm:$0xff] %vm848_vm2, %v3766_v18  ;;  %2330 = vmatprep.subr.bf16.mxu1 %v3766_v18  ;;  %v961_v20 = vshrl.u32 %v960_v19, 7  ;;  %v937_v23 = vld [vmem:[%s3759_s4] sm:$0x7] }
  0x18   : > { %849 = vst.msk [vmem:[#allocation2] sm:$0xff] %vm848_vm2, %v3766_v18  ;;  %850 = vst.msk [vmem:[#allocation2 + $0x8] sm:$0xff] %vm848_vm2, %v3766_v18  ;;  %2350 = vmatprep.subr.bf16.mxu0 %v3766_v18  ;;  %v2772_v26 = vld [vmem:[%s3758_s3] ss:$0 sm:$0xff]  ;;  %v939_v1 = vld [vmem:[%s3759_s4 + $0x8] sm:$0x7] }
  0x19   : > { %s2258_s28 = sshll.u32 %s2607_s27, 7  ;;  %853 = vst.msk [vmem:[#allocation2 + $0x18] sm:$0xff] %vm848_vm2, %v3766_v18  ;;  %854 = vst.msk [vmem:[#allocation2 + $0x20] sm:$0xff] %vm848_vm2, %v3766_v18  ;;  %v2762_v22 = vsub.s32 0, %v961_v20  ;;  %v2767_v24 = vsub.s32 1, %v961_v20  ;;  %v1066_v37 = vsub.s32 2, %v961_v20 }
  0x1a   : > { %s2613_s11 = scalar_lea.vmem %s3755_s0, %s2258_s28  ;;  %859 = vst.msk [vmem:[#allocation2 + $0x48] sm:$0xff] %vm848_vm2, %v3766_v18  ;;  %860 = vst.msk [vmem:[#allocation2 + $0x50] sm:$0xff] %vm848_vm2, %v3766_v18  ;;  %s2259_s12 = sshll.u32 %s2607_s27, 3 }
  0x1b   : > { %v2414_v2 = vld [vmem:[%s2613_s11] sm:$0xff]   ;;  %v2415_v3 = vld [vmem:[%s2613_s11 + $0x8] sm:$0xff]   ;;  %v2416_v4 = vld [vmem:[%s2613_s11 + $0x10] sm:$0xff]   ;;  %862 = vst.msk [vmem:[#allocation2 + $0x60] sm:$0xff] %vm848_vm2, %v3766_v18  ;;  %v2777_v31 = vrot.slane %v937_v23, %v2762_v22  ;;  %v2782_v36 = vrot.slane %v937_v23, %v2767_v24  ;;  %v2790_v51 = vrot.slane %v937_v23, %v1066_v37  ;;  %s365_s18 = sand.u32 1, %s2485_s14   ;;  %s377_s25 = scalar_lea.vmem %s3764_s9, %s2259_s12 }
  0x1c   : > { %2298 = vmatprep.mubr.msk.bf16.mxu0 %vm492_vm1, %v2414_v2  ;;  %v2417_v5 = vld [vmem:[%s2613_s11 + $0x18] sm:$0xff]   ;;  %v2418_v6 = vld [vmem:[%s2613_s11 + $0x20] sm:$0xff]   ;;  %v2419_v7 = vld [vmem:[%s2613_s11 + $0x28] sm:$0xff]   ;;  %863 = vst.msk [vmem:[#allocation2 + $0x68] sm:$0xff] %vm848_vm2, %v3766_v18  ;;  %s2209_s26 = sshll.u32 %s365_s18, 3  ;;  %s2260_s27 = sshll.u32 %s2575_s17, 7 }
  0x1d   : > { %2299 = vmatmul.mubr.msk.bf16.vlgmr.msra.gmra.mrb[0].mxu0 %vm492_vm1, %v2415_v3  ;;  %v2420_v8 = vld [vmem:[%s2613_s11 + $0x30] sm:$0xff]   ;;  %v2421_v9 = vld [vmem:[%s2613_s11 + $0x38] sm:$0xff]   ;;  %v2422_v10 = vld [vmem:[%s2613_s11 + $0x40] sm:$0xff]   ;;  %865 = vst.msk [vmem:[#allocation2 + $0x78] sm:$0xff] %vm848_vm2, %v3766_v18  ;;  %s367_s28 = scalar_lea.vmem [#allocation3], %s2209_s26  ;;  %s3713_s12 = scalar_lea.hbm %s3765_s10, %s2260_s27 }
  0x1e   : > { %2302 = vmatprep.mubr.msk.bf16.mxu0 %vm492_vm1, %v2416_v4  ;;  %v2423_v11 = vld [vmem:[%s2613_s11 + $0x48] sm:$0xff]   ;;  %v2424_v12 = vld [vmem:[%s2613_s11 + $0x50] sm:$0xff]   ;;  %v2425_v13 = vld [vmem:[%s2613_s11 + $0x58] sm:$0xff]   ;;  %866 = vst.msk [vmem:[#allocation2 + $0x80] sm:$0xff] %vm848_vm2, %v3766_v18  ;;  %s2134_s29 = sshll.u32 %s367_s28, 4  ;;  %s2120_s20 = scalar_lea.sflag [#allocation4], %s365_s18  ;;  %s3715_s29 = int_to_ptr.vmem [resolvable:$true] %s2134_s29 }
  0x1f   : > { %v2426_v14 = vld [vmem:[%s2613_s11 + $0x60] sm:$0xff]   ;;  %v2427_v15 = vld [vmem:[%s2613_s11 + $0x68] sm:$0xff]   ;;  %v2428_v16 = vld [vmem:[%s2613_s11 + $0x70] sm:$0xff]   ;;  %868 = vst.msk [vmem:[#allocation2 + $0x90] sm:$0xff] %vm848_vm2, %v3766_v18  ;;  %s2431_s21 = scalar_lea.vmem %s3715_s29, 128  ;;  %s2498_s17 = smov [#allocation3]  }
  0x20   : > { %v2429_v17 = vld [vmem:[%s2613_s11 + $0x78] sm:$0xff]   ;;  %869 = vst.msk [vmem:[#allocation2 + $0x98] sm:$0xff] %vm848_vm2, %v3766_v18  ;;  %871 = vst.msk [vmem:[#allocation2 + $0xa8] sm:$0xff] %vm848_vm2, %v3766_v18  ;;  %v944_v35 = vld [vmem:[#allocation2] sm:$0xff]  ;;  %p2432_p11 = scmp.ne.s32.totalorder %s3715_s29, %s2431_s21 }
  0x21   : > { %872 = vst.msk [vmem:[#allocation2 + $0xb0] sm:$0xff] %vm848_vm2, %v3766_v18  ;;  %874 = vst.msk [vmem:[#allocation2 + $0xc0] sm:$0xff] %vm848_vm2, %v3766_v18  ;;  %v996_v40 = vld [vmem:[#allocation2 + $0x1] sm:$0xff]  ;;  %v964_v47 = vmul.f32 %v2777_v31, %v944_v35 }
  0x22   : > { %875 = vst.msk [vmem:[#allocation2 + $0xc8] sm:$0xff] %vm848_vm2, %v3766_v18  ;;  %877 = vst.msk [vmem:[#allocation2 + $0xd8] sm:$0xff] %vm848_vm2, %v3766_v18  ;;  %v945_v43 = vld [vmem:[#allocation2 + $0x8] sm:$0xff]  ;;  %v1016_v50 = vmul.f32 %v2782_v36, %v996_v40  ;;  %p2433_p12 = pnand %p2432_p11, %p2592_p5 }
  0x23   : > { %878 = vst.msk [vmem:[#allocation2 + $0xe0] sm:$0xff] %vm848_vm2, %v3766_v18  ;;  %880 = vst.msk [vmem:[#allocation2 + $0xf0] sm:$0xff] %vm848_vm2, %v3766_v18  ;;  %v965_v55 = vmul.f32 %v2777_v31, %v945_v43  ;;  %v1048_v57 = vld [vmem:[#allocation2 + $0x2] sm:$0xff] }
  0x24   : > { %881 = vst.msk [vmem:[#allocation2 + $0xf8] sm:$0xff] %vm848_vm2, %v3766_v18  ;;  %883 = vst.msk [vmem:[#allocation2 + $0x108] sm:$0xff] %vm848_vm2, %v3766_v18  ;;  %p2434_p13 = pneg %p2433_p12 }
  0x25   : > { %2303 = vmatmul.mubr.msk.bf16.gmra.mrb[4].mxu0 %vm492_vm1, %v2417_v5  ;;  %884 = vst.msk [vmem:[#allocation2 + $0x110] sm:$0xff] %vm848_vm2, %v3766_v18  ;;  %886 = vst.msk [vmem:[#allocation2 + $0x120] sm:$0xff] %vm848_vm2, %v3766_v18  ;;  %v938_v5 = vld [vmem:[%s3759_s4 + $0x4] sm:$0x7] }
  0x26   : > { %2306 = vmatprep.mubr.msk.bf16.mxu0 %vm492_vm1, %v2418_v6  ;;  %887 = vst.msk [vmem:[#allocation2 + $0x128] sm:$0xff] %vm848_vm2, %v3766_v18  ;;  %889 = vst.msk [vmem:[#allocation2 + $0x138] sm:$0xff] %vm848_vm2, %v3766_v18  ;;  %v1032_v6 = vadd.f32 %v1016_v50, %v964_v47  ;;  %v2821_v19 = vrot.slane %v938_v5, %v2762_v22  ;;  %v2824_v20 = vrot.slane %v938_v5, %v2767_v24 }
  0x27   : > { %890 = vst.msk [vmem:[#allocation2 + $0x140] sm:$0xff] %vm848_vm2, %v3766_v18  ;;  %892 = vst.msk [vmem:[#allocation2 + $0x150] sm:$0xff] %vm848_vm2, %v3766_v18 }
  0x28   : > { %893 = vst.msk [vmem:[#allocation2 + $0x158] sm:$0xff] %vm848_vm2, %v3766_v18  ;;  %895 = vst.msk [vmem:[#allocation2 + $0x168] sm:$0xff] %vm848_vm2, %v3766_v18 }
  0x29   : > { %896 = vst.msk [vmem:[#allocation2 + $0x170] sm:$0xff] %vm848_vm2, %v3766_v18  ;;  %898 = vst.msk [vmem:[#allocation2 + $0x180] sm:$0xff] %vm848_vm2, %v3766_v18 }
  0x2a   : > { %899 = vst.msk [vmem:[#allocation2 + $0x188] sm:$0xff] %vm848_vm2, %v3766_v18  ;;  %901 = vst.msk [vmem:[#allocation2 + $0x198] sm:$0xff] %vm848_vm2, %v3766_v18 }
  0x2b   : > { %902 = vst.msk [vmem:[#allocation2 + $0x1a0] sm:$0xff] %vm848_vm2, %v3766_v18 }
  0x2c   : > { %858 = vst.msk [vmem:[#allocation2 + $0x40] sm:$0x3] %vm851_vm3, %v3766_v18  ;;  %852 = vst.msk [vmem:[#allocation2 + $0x10] sm:$0x3] %vm851_vm3, %v3766_v18 }
  0x2d   : > { %2307 = vmatmul.mubr.msk.bf16.gmra.mrb[8].mxu0 %vm492_vm1, %v2419_v7  ;;  %855 = vst.msk [vmem:[#allocation2 + $0x28] sm:$0x3] %vm851_vm3, %v3766_v18  ;;  %861 = vst.msk [vmem:[#allocation2 + $0x58] sm:$0x3] %vm851_vm3, %v3766_v18  ;;  %v1068_v7 = vmul.f32 %v2790_v51, %v1048_v57 }
  0x2e   : > { %2310 = vmatprep.mubr.msk.bf16.mxu0 %vm492_vm1, %v2420_v8  ;;  %864 = vst.msk [vmem:[#allocation2 + $0x70] sm:$0x3] %vm851_vm3, %v3766_v18  ;;  %867 = vst.msk [vmem:[#allocation2 + $0x88] sm:$0x3] %vm851_vm3, %v3766_v18 }
  0x2f   : > { %870 = vst.msk [vmem:[#allocation2 + $0xa0] sm:$0x3] %vm851_vm3, %v3766_v18  ;;  %873 = vst.msk [vmem:[#allocation2 + $0xb8] sm:$0x3] %vm851_vm3, %v3766_v18 }
  0x30   : > { %876 = vst.msk [vmem:[#allocation2 + $0xd0] sm:$0x3] %vm851_vm3, %v3766_v18  ;;  %879 = vst.msk [vmem:[#allocation2 + $0xe8] sm:$0x3] %vm851_vm3, %v3766_v18 }
  0x31   : > { %882 = vst.msk [vmem:[#allocation2 + $0x100] sm:$0x3] %vm851_vm3, %v3766_v18  ;;  %885 = vst.msk [vmem:[#allocation2 + $0x118] sm:$0x3] %vm851_vm3, %v3766_v18 }
  0x32   : > { %888 = vst.msk [vmem:[#allocation2 + $0x130] sm:$0x3] %vm851_vm3, %v3766_v18  ;;  %891 = vst.msk [vmem:[#allocation2 + $0x148] sm:$0x3] %vm851_vm3, %v3766_v18 }
  0x33   : > { %894 = vst.msk [vmem:[#allocation2 + $0x160] sm:$0x3] %vm851_vm3, %v3766_v18  ;;  %897 = vst.msk [vmem:[#allocation2 + $0x178] sm:$0x3] %vm851_vm3, %v3766_v18  ;;  %v997_v44 = vld [vmem:[#allocation2 + $0x9] sm:$0xff] }
  0x34   : > { %900 = vst.msk [vmem:[#allocation2 + $0x190] sm:$0x3] %vm851_vm3, %v3766_v18  ;;  %903 = vst.msk [vmem:[#allocation2 + $0x1a8] sm:$0x3] %vm851_vm3, %v3766_v18  ;;  %v1017_v56 = vmul.f32 %v2782_v36, %v997_v44  ;;  %v1049_v61 = vld [vmem:[#allocation2 + $0xa] sm:$0xff] }
  0x35   : > { %2311 = vmatmul.mubr.msk.bf16.gmra.mrb[12].mxu0 %vm492_vm1, %v2421_v9 }
  0x36   : > { %2314 = vmatprep.mubr.msk.bf16.mxu0 %vm492_vm1, %v2422_v10  ;;  %v1033_v10 = vadd.f32 %v1017_v56, %v965_v55 }
  0x3d   : > { %2315 = vmatmul.mubr.msk.bf16.gmra.mrb[16].mxu0 %vm492_vm1, %v2423_v11  ;;  %v1069_v11 = vmul.f32 %v2790_v51, %v1049_v61 }
  0x3e   : > { %2318 = vmatprep.mubr.msk.bf16.mxu0 %vm492_vm1, %v2424_v12 }
  0x45   : > { %2319 = vmatmul.mubr.msk.bf16.gmra.mrb[20].mxu0 %vm492_vm1, %v2425_v13 }
  0x46   : > { %2322 = vmatprep.mubr.msk.bf16.mxu0 %vm492_vm1, %v2426_v14  ;;  %v2814_v14 = vrot.slane %v939_v1, %v2762_v22 }
  0x4d   : > { %2323 = vmatmul.mubr.msk.bf16.gmra.mrb[24].mxu0 %vm492_vm1, %v2427_v15  ;;  %v2817_v15 = vrot.slane %v939_v1, %v2767_v24 }
  0x4e   : > { %2326 = vmatprep.mubr.msk.bf16.mxu0 %vm492_vm1, %v2428_v16 }
  0x55   : > { %2327 = vmatmul.mubr.msk.bf16.gmra.mrb[28].mxu0 %vm492_vm1, %v2429_v17 }
  0xf0   : > { %v2300_v25 = vpop.f32.mrb[0].mxu0 }
  0xf1   : > { %v715_v27 = vmul.f32 %v2300_v25, %v2760_v21  ;;  %v579_v28 = vpop.f32.mrb[1].mxu0 }
  0xf2   : > { %v713_v29 = vmul.f32 %v2760_v21, %v579_v28  ;;  %v2301_v30 = vpop.f32.mrb[2].mxu0  ;;  %v2826_v28 = vrot.slane %v938_v5, %v1066_v37 }
  0xf3   : > { %v754_v32 = vadd.f32 %v2772_v26, %v715_v27  ;;  %v716_v33 = vmul.f32 %v2301_v30, %v2760_v21  ;;  %v582_v34 = vpop.f32.mrb[3].mxu0  ;;  %v1084_v27 = vadd.f32 %v1068_v7, %v1032_v6 }
  0xf4   : > { %v752_v38 = vadd.f32 %v2772_v26, %v713_v29  ;;  %v714_v39 = vmul.f32 %v2760_v21, %v582_v34 }
  0xf5   : > { %v786_v41 = vmax.f32 %v754_v32, 0.0  ;;  %v755_v42 = vadd.f32 %v2772_v26, %v716_v33  ;;  %v1085_v33 = vadd.f32 %v1069_v11, %v1033_v10 }
  0xf6   : > { %v784_v45 = vmax.f32 %v752_v38, 0.0  ;;  %v753_v46 = vadd.f32 %v2772_v26, %v714_v39  ;;  %v2832_v38 = vrot.slane %v939_v1, %v1066_v37 }
  0xf7   : > { %v818_v48 = vmin.f32 %v786_v41, 6.0  ;;  %v787_v49 = vmax.f32 %v755_v42, 0.0 }
  0xf8   : > { %v816_v52 = vmin.f32 %v784_v45, 6.0  ;;  %v785_v53 = vmax.f32 %v753_v46, 0.0  ;;  %v2304_v54 = vpop.f32.mrb[4].mxu0 }
  0xf9   : > { %907 = vst.msk [vmem:[#allocation2 + $0x31] sm:$0xff] %vm848_vm2, %v818_v48  ;;  %v819_v58 = vmin.f32 %v787_v49, 6.0  ;;  %v719_v59 = vmul.f32 %v2304_v54, %v2760_v21  ;;  %v595_v60 = vpop.f32.mrb[5].mxu0 }
  0xfa   : > { %905 = vst.msk [vmem:[#allocation2 + $0x19] sm:$0xff] %vm848_vm2, %v816_v52  ;;  %v817_v62 = vmin.f32 %v785_v53, 6.0  ;;  %v717_v63 = vmul.f32 %v2760_v21, %v595_v60  ;;  %v2305_v0 = vpop.f32.mrb[6].mxu0 }
  0xfb   : > { %908 = vst.msk [vmem:[#allocation2 + $0x39] sm:$0xff] %vm848_vm2, %v819_v58  ;;  %v758_v2 = vadd.f32 %v2772_v26, %v719_v59  ;;  %v720_v3 = vmul.f32 %v2305_v0, %v2760_v21  ;;  %v598_v4 = vpop.f32.mrb[7].mxu0 }
  0xfc   : > { %906 = vst.msk [vmem:[#allocation2 + $0x21] sm:$0xff] %vm848_vm2, %v817_v62  ;;  %v756_v8 = vadd.f32 %v2772_v26, %v717_v63  ;;  %v718_v9 = vmul.f32 %v2760_v21, %v598_v4 }
  0xfd   : > { %v790_v12 = vmax.f32 %v758_v2, 0.0  ;;  %v759_v13 = vadd.f32 %v2772_v26, %v720_v3 }
  0xfe   : > { %v788_v16 = vmax.f32 %v756_v8, 0.0  ;;  %v757_v17 = vadd.f32 %v2772_v26, %v718_v9 }
  0xff   : > { %v822_v23 = vmin.f32 %v790_v12, 6.0  ;;  %v791_v25 = vmax.f32 %v759_v13, 0.0 }
 0x100   : > { %v820_v29 = vmin.f32 %v788_v16, 6.0  ;;  %v789_v30 = vmax.f32 %v757_v17, 0.0  ;;  %v2308_v32 = vpop.f32.mrb[8].mxu0  ;;  %v2828_v34 = vld [vmem:[#allocation2 + $0x30] sm:$0xff] }
 0x101   : > { %v2830_v35 = vld [vmem:[#allocation2 + $0x31] sm:$0xff]  ;;  %911 = vst.msk [vmem:[#allocation2 + $0x61] sm:$0xff] %vm848_vm2, %v822_v23  ;;  %v823_v22 = vmin.f32 %v791_v25, 6.0  ;;  %v723_v24 = vmul.f32 %v2308_v32, %v2760_v21  ;;  %v611_v39 = vpop.f32.mrb[9].mxu0  ;;  %v1152_v41 = vld [vmem:[#allocation2 + $0x19] sm:$0xff]  ;;  %v1277_v42 = vmul.f32 %v2814_v14, %v2828_v34 }
 0x102   : > { %v1100_v40 = vld [vmem:[#allocation2 + $0x18] sm:$0xff]  ;;  %v2840_v43 = vmul.f32 %v2817_v15, %v2830_v35  ;;  %909 = vst.msk [vmem:[#allocation2 + $0x49] sm:$0xff] %vm848_vm2, %v820_v29  ;;  %v821_v44 = vmin.f32 %v789_v30, 6.0  ;;  %v721_v37 = vmul.f32 %v2760_v21, %v611_v39  ;;  %v2309_v45 = vpop.f32.mrb[10].mxu0  ;;  %v1172_v47 = vmul.f32 %v2824_v20, %v1152_v41 }
 0x103   : > { %v1120_v46 = vmul.f32 %v2821_v19, %v1100_v40  ;;  %v2846_v48 = vld [vmem:[#allocation2 + $0x38] sm:$0xff]  ;;  %912 = vst.msk [vmem:[#allocation2 + $0x69] sm:$0xff] %vm848_vm2, %v823_v22  ;;  %v762_v50 = vadd.f32 %v2772_v26, %v723_v24  ;;  %v724_v52 = vmul.f32 %v2309_v45, %v2760_v21  ;;  %v614_v53 = vpop.f32.mrb[11].mxu0  ;;  %v1101_v54 = vld [vmem:[#allocation2 + $0x20] sm:$0xff]  ;;  %v966_v22 = vmul.f32 %v1100_v40, %v2777_v31 }
 0x104   : > { %v2848_v49 = vld [vmem:[#allocation2 + $0x39] sm:$0xff]  ;;  %v1153_v55 = vld [vmem:[#allocation2 + $0x21] sm:$0xff]  ;;  %v1278_v57 = vmul.f32 %v2814_v14, %v2846_v48  ;;  %910 = vst.msk [vmem:[#allocation2 + $0x51] sm:$0xff] %vm848_vm2, %v821_v44  ;;  %v760_v59 = vadd.f32 %v2772_v26, %v721_v37  ;;  %v722_v60 = vmul.f32 %v2760_v21, %v614_v53  ;;  %v1121_v61 = vmul.f32 %v2821_v19, %v1101_v54 }
 0x105   : > { %v2853_v56 = vld [vmem:[#allocation2 + $0x1a] sm:$0xff]  ;;  %v1330_v58 = vmul.f32 %v2817_v15, %v2848_v49  ;;  %v1136_v62 = vadd.f32 %v1120_v46, %v1084_v27  ;;  %v2863_v63 = vld [vmem:[#allocation2 + $0x22] sm:$0xff]  ;;  %v2865_v0 = vld [vmem:[#allocation2 + $0x32] sm:$0xff]  ;;  %v794_v1 = vmax.f32 %v762_v50, 0.0  ;;  %v763_v2 = vadd.f32 %v2772_v26, %v724_v52 }
 0x106   : > { %v1173_v3 = vmul.f32 %v2824_v20, %v1153_v55  ;;  %v1224_v4 = vmul.f32 %v2826_v28, %v2853_v56  ;;  %v792_v5 = vmax.f32 %v760_v59, 0.0  ;;  %v761_v6 = vadd.f32 %v2772_v26, %v722_v60  ;;  %v2872_v9 = vld [vmem:[#allocation2 + $0x3a] sm:$0xff] }
 0x107   : > { %v1137_v7 = vadd.f32 %v1121_v61, %v1085_v33  ;;  %v1188_v8 = vadd.f32 %v1172_v47, %v1136_v62  ;;  %v826_v10 = vmin.f32 %v794_v1, 6.0  ;;  %v795_v11 = vmax.f32 %v763_v2, 0.0  ;;  %v2898_v1 = vld [vmem:[%s3760_s5] ss:$0 sm:$0xff] }
 0x108   : > { %v1225_v12 = vmul.f32 %v2826_v28, %v2863_v63  ;;  %v1381_v13 = vmul.f32 %v2832_v38, %v2865_v0  ;;  %v824_v16 = vmin.f32 %v792_v5, 6.0  ;;  %v793_v17 = vmax.f32 %v761_v6, 0.0  ;;  %v2312_v23 = vpop.f32.mrb[12].mxu0 }
 0x109   : > { %v1189_v25 = vadd.f32 %v1173_v3, %v1137_v7  ;;  %v1240_v27 = vadd.f32 %v1224_v4, %v1188_v8  ;;  %915 = vst.msk [vmem:[#allocation2 + $0x91] sm:$0xff] %vm848_vm2, %v826_v10  ;;  %v827_v29 = vmin.f32 %v795_v11, 6.0  ;;  %v727_v30 = vmul.f32 %v2312_v23, %v2760_v21  ;;  %v627_v32 = vpop.f32.mrb[13].mxu0 }
 0x10a   : > { %v1382_v33 = vmul.f32 %v2832_v38, %v2872_v9  ;;  %913 = vst.msk [vmem:[#allocation2 + $0x79] sm:$0xff] %vm848_vm2, %v824_v16  ;;  %v825_v24 = vmin.f32 %v793_v17, 6.0  ;;  %v725_v39 = vmul.f32 %v2760_v21, %v627_v32  ;;  %v2313_v44 = vpop.f32.mrb[14].mxu0  ;;  %v967_v52 = vmul.f32 %v1101_v54, %v2777_v31 }
 0x10b   : > { %v1241_v37 = vadd.f32 %v1225_v12, %v1189_v25  ;;  %v1293_v45 = vadd.f32 %v1277_v42, %v1240_v27  ;;  %916 = vst.msk [vmem:[#allocation2 + $0x99] sm:$0xff] %vm848_vm2, %v827_v29  ;;  %v766_v46 = vadd.f32 %v2772_v26, %v727_v30  ;;  %v728_v47 = vmul.f32 %v2313_v44, %v2760_v21  ;;  %v630_v50 = vpop.f32.mrb[15].mxu0 }
 0x10c   : > { %v1018_v53 = vmul.f32 %v1152_v41, %v2782_v36  ;;  %914 = vst.msk [vmem:[#allocation2 + $0x81] sm:$0xff] %vm848_vm2, %v825_v24  ;;  %v764_v40 = vadd.f32 %v2772_v26, %v725_v39  ;;  %v726_v59 = vmul.f32 %v2760_v21, %v630_v50  ;;  %v1019_v54 = vmul.f32 %v1153_v55, %v2782_v36 }
 0x10d   : > { %v1294_v60 = vadd.f32 %v1278_v57, %v1241_v37  ;;  %v1345_v42 = vadd.f32 %v2840_v43, %v1293_v45  ;;  %v798_v61 = vmax.f32 %v766_v46, 0.0  ;;  %v767_v62 = vadd.f32 %v2772_v26, %v728_v47 }
 0x10e   : > { %v1034_v41 = vadd.f32 %v1018_v53, %v966_v22  ;;  %v796_v2 = vmax.f32 %v764_v40, 0.0  ;;  %v765_v3 = vadd.f32 %v2772_v26, %v726_v59  ;;  %v1035_v7 = vadd.f32 %v1019_v54, %v967_v52 }
 0x10f   : > { %v1346_v4 = vadd.f32 %v1330_v58, %v1294_v60  ;;  %v1397_v5 = vadd.f32 %v1381_v13, %v1345_v42  ;;  %v830_v6 = vmin.f32 %v798_v61, 6.0  ;;  %v799_v57 = vmax.f32 %v767_v62, 0.0 }
 0x110   : > { %v1070_v43 = vmul.f32 %v2853_v56, %v2790_v51  ;;  %v828_v8 = vmin.f32 %v796_v2, 6.0  ;;  %v797_v10 = vmax.f32 %v765_v3, 0.0  ;;  %v2316_v11 = vpop.f32.mrb[16].mxu0  ;;  %v1071_v58 = vmul.f32 %v2863_v63, %v2790_v51 }
 0x111   : > { %v1398_v12 = vadd.f32 %v1382_v33, %v1346_v4  ;;  %v1419_v16 = vadd.f32 %v2898_v1, %v1397_v5  ;;  %919 = vst.msk [vmem:[#allocation2 + $0xc1] sm:$0xff] %vm848_vm2, %v830_v6  ;;  %v831_v55 = vmin.f32 %v799_v57, 6.0  ;;  %v731_v17 = vmul.f32 %v2316_v11, %v2760_v21  ;;  %v643_v23 = vpop.f32.mrb[17].mxu0  ;;  %v2928_v6 = vld [vmem:[#allocation2 + $0x48] sm:$0xff]  ;;  %v2934_v11 = vld [vmem:[#allocation2 + $0x50] sm:$0xff] }
 0x112   : > { %v1086_v13 = vadd.f32 %v1070_v43, %v1034_v41  ;;  %917 = vst.msk [vmem:[#allocation2 + $0xa9] sm:$0xff] %vm848_vm2, %v828_v8  ;;  %v829_v25 = vmin.f32 %v797_v10, 6.0  ;;  %v729_v56 = vmul.f32 %v2760_v21, %v643_v23  ;;  %v2317_v27 = vpop.f32.mrb[18].mxu0  ;;  %v1087_v24 = vadd.f32 %v1071_v58, %v1035_v7  ;;  %v2941_v58 = vld [vmem:[#allocation2 + $0x49] sm:$0xff] }
 0x113   : > { %v1420_v29 = vadd.f32 %v2898_v1, %v1398_v12  ;;  %v1435_v30 = vmax.f32 %v1419_v16, 0.0  ;;  %920 = vst.msk [vmem:[#allocation2 + $0xc9] sm:$0xff] %vm848_vm2, %v831_v55  ;;  %v770_v32 = vadd.f32 %v2772_v26, %v731_v17  ;;  %v732_v33 = vmul.f32 %v2317_v27, %v2760_v21  ;;  %v646_v22 = vpop.f32.mrb[19].mxu0 }
 0x114   : > { %v1122_v63 = vmul.f32 %v2828_v34, %v2821_v19  ;;  %918 = vst.msk [vmem:[#allocation2 + $0xb1] sm:$0xff] %vm848_vm2, %v829_v25  ;;  %v768_v39 = vadd.f32 %v2772_v26, %v729_v56  ;;  %v730_v44 = vmul.f32 %v2760_v21, %v646_v22  ;;  %v1123_v50 = vmul.f32 %v2846_v48, %v2821_v19 }
 0x115   : > { %v1436_v37 = vmax.f32 %v1420_v29, 0.0  ;;  %v1451_v45 = vmin.f32 %v1435_v30, 6.0  ;;  %v802_v46 = vmax.f32 %v770_v32, 0.0  ;;  %v771_v47 = vadd.f32 %v2772_v26, %v732_v33  ;;  %v2948_v30 = vld [vmem:[#allocation2 + $0x51] sm:$0xff] }
 0x116   : > { %v1138_v52 = vadd.f32 %v1122_v63, %v1086_v13  ;;  %v800_v53 = vmax.f32 %v768_v39, 0.0  ;;  %v769_v40 = vadd.f32 %v2772_v26, %v730_v44  ;;  %v1174_v60 = vmul.f32 %v2830_v35, %v2824_v20  ;;  %v2956_v63 = vld [vmem:[#allocation2 + $0x4a] sm:$0xff] }
 0x117   : > { %v1452_v59 = vmin.f32 %v1436_v37, 6.0  ;;  %v834_v42 = vmin.f32 %v802_v46, 6.0  ;;  %v803_v61 = vmax.f32 %v771_v47, 0.0  ;;  %v1139_v62 = vadd.f32 %v1123_v50, %v1087_v24  ;;  %v2961_v46 = vld [vmem:[#allocation2 + $0x52] sm:$0xff] }
 0x118   : > { %v1175_v54 = vmul.f32 %v2848_v49, %v2824_v20  ;;  %v832_v41 = vmin.f32 %v800_v53, 6.0  ;;  %v801_v2 = vmax.f32 %v769_v40, 0.0  ;;  %v2320_v3 = vpop.f32.mrb[20].mxu0  ;;  %v1190_v5 = vadd.f32 %v1174_v60, %v1138_v52 }
 0x119   : > { %v1467_v4 = vpack.c.bf16 %v1452_v59, %v1451_v45  ;;  %923 = vst.msk [vmem:[#allocation2 + $0xf1] sm:$0xff] %vm848_vm2, %v834_v42  ;;  %v835_v57 = vmin.f32 %v803_v61, 6.0  ;;  %v735_v7 = vmul.f32 %v2320_v3, %v2760_v21  ;;  %v659_v43 = vpop.f32.mrb[21].mxu0  ;;  %v1226_v10 = vmul.f32 %v2865_v0, %v2826_v28 }
 0x11a   : > { %v1191_v8 = vadd.f32 %v1175_v54, %v1139_v62  ;;  %921 = vst.msk [vmem:[#allocation2 + $0xd9] sm:$0xff] %vm848_vm2, %v832_v41  ;;  %v833_v12 = vmin.f32 %v801_v2, 6.0  ;;  %v733_v16 = vmul.f32 %v2760_v21, %v659_v43  ;;  %v2321_v55 = vpop.f32.mrb[22].mxu0  ;;  %v1227_v23 = vmul.f32 %v2872_v9, %v2826_v28 }
 0x11b   : > { %v1479_v17 = vsel %vm848_vm2, %v1467_v4, 0  ;;  %924 = vst.msk [vmem:[#allocation2 + $0xf9] sm:$0xff] %vm848_vm2, %v835_v57  ;;  %v774_v13 = vadd.f32 %v2772_v26, %v735_v7  ;;  %v736_v25 = vmul.f32 %v2321_v55, %v2760_v21  ;;  %v662_v56 = vpop.f32.mrb[23].mxu0  ;;  %v1242_v27 = vadd.f32 %v1226_v10, %v1190_v5 }
 0x11c   : > { %2331 = vmatpush3.bf16.xpose.msra.mxu1 %v1479_v17  ;;  %v1279_v29 = vmul.f32 %v2814_v14, %v2928_v6  ;;  %922 = vst.msk [vmem:[#allocation2 + $0xe1] sm:$0xff] %vm848_vm2, %v833_v12  ;;  %v772_v32 = vadd.f32 %v2772_v26, %v733_v16  ;;  %v734_v33 = vmul.f32 %v2760_v21, %v662_v56 }
 0x11d   : > { %2332 = vmatprep.subr.bf16.mxu1 %v3766_v18  ;;  %v1243_v22 = vadd.f32 %v1227_v23, %v1191_v8  ;;  %v1280_v24 = vmul.f32 %v2814_v14, %v2934_v11  ;;  %v806_v39 = vmax.f32 %v774_v13, 0.0  ;;  %v775_v44 = vadd.f32 %v2772_v26, %v736_v25 }
 0x11e   : > { %v1295_v37 = vadd.f32 %v1279_v29, %v1242_v27  ;;  %v1331_v45 = vmul.f32 %v2817_v15, %v2941_v58  ;;  %v804_v47 = vmax.f32 %v772_v32, 0.0  ;;  %v773_v50 = vadd.f32 %v2772_v26, %v734_v33 }
 0x11f   : > { %v1296_v52 = vadd.f32 %v1280_v24, %v1243_v22  ;;  %v1332_v53 = vmul.f32 %v2817_v15, %v2948_v30  ;;  %v838_v40 = vmin.f32 %v806_v39, 6.0  ;;  %v807_v59 = vmax.f32 %v775_v44, 0.0 }
 0x120   : > { %v1347_v60 = vadd.f32 %v1331_v45, %v1295_v37  ;;  %v1383_v42 = vmul.f32 %v2832_v38, %v2956_v63  ;;  %v836_v61 = vmin.f32 %v804_v47, 6.0  ;;  %v805_v62 = vmax.f32 %v773_v50, 0.0  ;;  %v2324_v54 = vpop.f32.mrb[24].mxu0 }
 0x121   : > { %v1348_v41 = vadd.f32 %v1332_v53, %v1296_v52  ;;  %v1384_v2 = vmul.f32 %v2832_v38, %v2961_v46  ;;  %927 = vst.msk [vmem:[#allocation2 + $0x121] sm:$0xff] %vm848_vm2, %v838_v40  ;;  %v839_v3 = vmin.f32 %v807_v59, 6.0  ;;  %v739_v4 = vmul.f32 %v2324_v54, %v2760_v21  ;;  %v675_v5 = vpop.f32.mrb[25].mxu0  ;;  %v3001_v54 = vld [vmem:[#allocation2 + $0x60] sm:$0xff] }
 0x122   : > { %v1399_v57 = vadd.f32 %v1383_v42, %v1347_v60  ;;  %v968_v7 = vmul.f32 %v2828_v34, %v2777_v31  ;;  %925 = vst.msk [vmem:[#allocation2 + $0x109] sm:$0xff] %vm848_vm2, %v836_v61  ;;  %v837_v43 = vmin.f32 %v805_v62, 6.0  ;;  %v737_v8 = vmul.f32 %v2760_v21, %v675_v5  ;;  %v2325_v10 = vpop.f32.mrb[26].mxu0  ;;  %v3008_v5 = vld [vmem:[#allocation2 + $0x61] sm:$0xff] }
 0x123   : > { %v1400_v12 = vadd.f32 %v1384_v2, %v1348_v41  ;;  %v969_v16 = vmul.f32 %v2846_v48, %v2777_v31  ;;  %928 = vst.msk [vmem:[#allocation2 + $0x129] sm:$0xff] %vm848_vm2, %v839_v3  ;;  %v778_v55 = vadd.f32 %v2772_v26, %v739_v4  ;;  %v740_v17 = vmul.f32 %v2325_v10, %v2760_v21  ;;  %v678_v23 = vpop.f32.mrb[27].mxu0 }
 0x124   : > { %v1421_v13 = vadd.f32 %v2898_v1, %v1399_v57  ;;  %v1020_v34 = vmul.f32 %v2830_v35, %v2782_v36  ;;  %926 = vst.msk [vmem:[#allocation2 + $0x111] sm:$0xff] %vm848_vm2, %v837_v43  ;;  %v776_v25 = vadd.f32 %v2772_v26, %v737_v8  ;;  %v738_v56 = vmul.f32 %v2760_v21, %v678_v23  ;;  %v3010_v57 = vld [vmem:[#allocation2 + $0x69] sm:$0xff] }
 0x125   : > { %v1422_v48 = vadd.f32 %v2898_v1, %v1400_v12  ;;  %v1021_v27 = vmul.f32 %v2848_v49, %v2782_v36  ;;  %v810_v29 = vmax.f32 %v778_v55, 0.0  ;;  %v779_v32 = vadd.f32 %v2772_v26, %v740_v17  ;;  %v3021_v55 = vld [vmem:[#allocation2 + $0x6a] sm:$0xff] }
 0x126   : > { %v1437_v33 = vmax.f32 %v1421_v13, 0.0  ;;  %v1036_v22 = vadd.f32 %v1020_v34, %v968_v7  ;;  %v808_v24 = vmax.f32 %v776_v25, 0.0  ;;  %v777_v39 = vadd.f32 %v2772_v26, %v738_v56  ;;  %v3012_v7 = vld [vmem:[#allocation2 + $0x62] sm:$0xff] }
 0x127   : > { %v1438_v35 = vmax.f32 %v1422_v48, 0.0  ;;  %v1037_v44 = vadd.f32 %v1021_v27, %v969_v16  ;;  %v842_v37 = vmin.f32 %v810_v29, 6.0  ;;  %v811_v45 = vmax.f32 %v779_v32, 0.0 }
 0x128   : > { %v1453_v47 = vmin.f32 %v1437_v33, 6.0  ;;  %v1072_v50 = vmul.f32 %v2865_v0, %v2790_v51  ;;  %v840_v52 = vmin.f32 %v808_v24, 6.0  ;;  %v809_v53 = vmax.f32 %v777_v39, 0.0  ;;  %v2328_v59 = vpop.f32.mrb[28].mxu0  ;;  %v3003_v0 = vld [vmem:[#allocation2 + $0x68] sm:$0xff] }
 0x129   : > { %v1454_v40 = vmin.f32 %v1438_v35, 6.0  ;;  %v1073_v49 = vmul.f32 %v2872_v9, %v2790_v51  ;;  %931 = vst.msk [vmem:[#allocation2 + $0x151] sm:$0xff] %vm848_vm2, %v842_v37  ;;  %v843_v60 = vmin.f32 %v811_v45, 6.0  ;;  %v1124_v61 = vmul.f32 %v2928_v6, %v2821_v19  ;;  %v691_v41 = vpop.f32.mrb[29].mxu0 }
 0x12a   : > { %v1088_v42 = vadd.f32 %v1072_v50, %v1036_v22  ;;  %v1125_v62 = vmul.f32 %v2934_v11, %v2821_v19  ;;  %929 = vst.msk [vmem:[#allocation2 + $0x139] sm:$0xff] %vm848_vm2, %v840_v52  ;;  %v841_v2 = vmin.f32 %v809_v53, 6.0  ;;  %v1176_v4 = vmul.f32 %v2941_v58, %v2824_v20  ;;  %v2329_v43 = vpop.f32.mrb[30].mxu0 }
 0x12b   : > { %v1468_v9 = vpack.c.bf16 %v1454_v40, %v1453_v47  ;;  %v1089_v3 = vadd.f32 %v1073_v49, %v1037_v44  ;;  %932 = vst.msk [vmem:[#allocation2 + $0x159] sm:$0xff] %vm848_vm2, %v843_v60  ;;  %v1177_v10 = vmul.f32 %v2948_v30, %v2824_v20  ;;  %v1228_v12 = vmul.f32 %v2956_v63, %v2826_v28  ;;  %v694_v17 = vpop.f32.mrb[31].mxu0 }
 0x12c   : > { %v1140_v8 = vadd.f32 %v1124_v61, %v1088_v42  ;;  %v1229_v16 = vmul.f32 %v2961_v46, %v2826_v28  ;;  %930 = vst.msk [vmem:[#allocation2 + $0x141] sm:$0xff] %vm848_vm2, %v841_v2  ;;  %v1281_v34 = vmul.f32 %v2814_v14, %v3001_v54  ;;  %v1282_v25 = vmul.f32 %v2814_v14, %v3003_v0 }
 0x12d   : > { %v1482_v23 = vsel %vm848_vm2, %v1468_v9, 0  ;;  %v1141_v13 = vadd.f32 %v1125_v62, %v1089_v3  ;;  %v1333_v48 = vmul.f32 %v2817_v15, %v3008_v5  ;;  %v1334_v27 = vmul.f32 %v2817_v15, %v3010_v57 }
 0x12e   : > { %2333 = vmatpush3.bf16.xpose.msra.mxu1 %v1482_v23  ;;  %v1192_v56 = vadd.f32 %v1176_v4, %v1140_v8  ;;  %v1385_v29 = vmul.f32 %v2832_v38, %v3012_v7  ;;  %v1386_v33 = vmul.f32 %v2832_v38, %v3021_v55  ;;  %v743_v22 = vmul.f32 %v2328_v59, %v2760_v21  ;;  %v3066_v23 = vld [vmem:[#allocation2 + $0x80] sm:$0xff] }
 0x12f   : > { %2334 = vmatprep.subr.bf16.mxu1 %v3766_v18  ;;  %v1193_v32 = vadd.f32 %v1177_v10, %v1141_v13  ;;  %v741_v24 = vmul.f32 %v2760_v21, %v691_v41  ;;  %v744_v35 = vmul.f32 %v2329_v43, %v2760_v21  ;;  %v742_v44 = vmul.f32 %v2760_v21, %v694_v17  ;;  %v3064_v17 = vld [vmem:[#allocation2 + $0x78] sm:$0xff] }
 0x130   : > { %v1244_v39 = vadd.f32 %v1228_v12, %v1192_v56  ;;  %v970_v37 = vmul.f32 %v2928_v6, %v2777_v31  ;;  %v782_v47 = vadd.f32 %v2772_v26, %v743_v22  ;;  %v971_v52 = vmul.f32 %v2934_v11, %v2777_v31  ;;  %v3077_v56 = vld [vmem:[#allocation2 + $0x81] sm:$0xff] }
 0x131   : > { %v1245_v45 = vadd.f32 %v1229_v16, %v1193_v32  ;;  %v780_v50 = vadd.f32 %v2772_v26, %v741_v24  ;;  %v783_v40 = vadd.f32 %v2772_v26, %v744_v35  ;;  %v781_v49 = vadd.f32 %v2772_v26, %v742_v44  ;;  %v3086_v22 = vld [vmem:[#allocation2 + $0x82] sm:$0xff] }
 0x132   : > { %v1297_v53 = vadd.f32 %v1281_v34, %v1244_v39  ;;  %v1022_v59 = vmul.f32 %v2941_v58, %v2782_v36  ;;  %v814_v60 = vmax.f32 %v782_v47, 0.0  ;;  %v1023_v6 = vmul.f32 %v2948_v30, %v2782_v36 }
 0x133   : > { %v1298_v21 = vadd.f32 %v1282_v25, %v1245_v45  ;;  %v812_v42 = vmax.f32 %v780_v50, 0.0  ;;  %v815_v62 = vmax.f32 %v783_v40, 0.0  ;;  %v813_v41 = vmax.f32 %v781_v49, 0.0  ;;  %v3075_v25 = vld [vmem:[#allocation2 + $0x79] sm:$0xff] }
 0x134   : > { %v1349_v61 = vadd.f32 %v1333_v48, %v1297_v53  ;;  %v1038_v2 = vadd.f32 %v1022_v59, %v970_v37  ;;  %v846_v11 = vmin.f32 %v814_v60, 6.0  ;;  %v1039_v4 = vadd.f32 %v1023_v6, %v971_v52 }
 0x135   : > { %v1350_v9 = vadd.f32 %v1334_v27, %v1298_v21  ;;  %v844_v3 = vmin.f32 %v812_v42, 6.0  ;;  %v847_v8 = vmin.f32 %v815_v62, 6.0  ;;  %v845_v26 = vmin.f32 %v813_v41, 6.0 }
 0x136   : > { %v1401_v43 = vadd.f32 %v1385_v29, %v1349_v61  ;;  %v1074_v58 = vmul.f32 %v2956_v63, %v2790_v51  ;;  %935 = vst.msk [vmem:[#allocation2 + $0x181] sm:$0xff] %vm848_vm2, %v846_v11  ;;  %v1075_v30 = vmul.f32 %v2961_v46, %v2790_v51  ;;  %v1126_v12 = vmul.f32 %v3001_v54, %v2821_v19 }
 0x137   : > { %v1402_v10 = vadd.f32 %v1386_v33, %v1350_v9  ;;  %933 = vst.msk [vmem:[#allocation2 + $0x169] sm:$0xff] %vm848_vm2, %v844_v3  ;;  %v1127_v16 = vmul.f32 %v3003_v0, %v2821_v19  ;;  %936 = vst.msk [vmem:[#allocation2 + $0x189] sm:$0xff] %vm848_vm2, %v847_v8  ;;  %v1178_v46 = vmul.f32 %v3008_v5, %v2824_v20  ;;  %v3084_v33 = vld [vmem:[#allocation2 + $0x7a] sm:$0xff] }
 0x138   : > { %v1423_v63 = vadd.f32 %v2898_v1, %v1401_v43  ;;  %934 = vst.msk [vmem:[#allocation2 + $0x171] sm:$0xff] %vm848_vm2, %v845_v26  ;;  %v1090_v13 = vadd.f32 %v1074_v58, %v1038_v2  ;;  %v1179_v34 = vmul.f32 %v3010_v57, %v2824_v20  ;;  %v1091_v27 = vadd.f32 %v1075_v30, %v1039_v4  ;;  %v3116_v43 = vld [vmem:[#allocation2 + $0x90] sm:$0xff] }
 0x139   : > { %v1424_v48 = vadd.f32 %v2898_v1, %v1402_v10  ;;  %v1230_v29 = vmul.f32 %v3012_v7, %v2826_v28  ;;  %v1231_v32 = vmul.f32 %v3021_v55, %v2826_v28  ;;  %v1283_v35 = vmul.f32 %v2814_v14, %v3064_v17  ;;  %v3125_v58 = vld [vmem:[#allocation2 + $0x91] sm:$0xff] }
 0x13a   : > { %v1439_v24 = vmax.f32 %v1423_v63, 0.0  ;;  %v1142_v39 = vadd.f32 %v1126_v12, %v1090_v13  ;;  %v1284_v44 = vmul.f32 %v2814_v14, %v3066_v23  ;;  %v1143_v45 = vadd.f32 %v1127_v16, %v1091_v27  ;;  %v3129_v63 = vld [vmem:[#allocation2 + $0x99] sm:$0xff] }
 0x13b   : > { %v1440_v37 = vmax.f32 %v1424_v48, 0.0  ;;  %v1335_v47 = vmul.f32 %v2817_v15, %v3075_v25  ;;  %v1336_v50 = vmul.f32 %v2817_v15, %v3077_v56  ;;  %v1387_v40 = vmul.f32 %v2832_v38, %v3084_v33  ;;  %v3131_v13 = vld [vmem:[#allocation2 + $0x92] sm:$0xff] }
 0x13c   : > { %v1455_v52 = vmin.f32 %v1439_v24, 6.0  ;;  %v1194_v53 = vadd.f32 %v1178_v46, %v1142_v39  ;;  %v1388_v49 = vmul.f32 %v2832_v38, %v3086_v22  ;;  %v1195_v21 = vadd.f32 %v1179_v34, %v1143_v45  ;;  %v3133_v46 = vld [vmem:[#allocation2 + $0x9a] sm:$0xff] }
 0x13d   : > { %v1456_v59 = vmin.f32 %v1440_v37, 6.0  ;;  %v972_v60 = vmul.f32 %v3001_v54, %v2777_v31  ;;  %v973_v42 = vmul.f32 %v3003_v0, %v2777_v31  ;;  %v1024_v61 = vmul.f32 %v3008_v5, %v2782_v36  ;;  %v3146_v37 = vld [vmem:[#allocation2 + $0xc8] sm:$0xff] }
 0x13e   : > { %v1246_v6 = vadd.f32 %v1230_v29, %v1194_v53  ;;  %v1025_v62 = vmul.f32 %v3010_v57, %v2782_v36  ;;  %v1076_v41 = vmul.f32 %v3012_v7, %v2790_v51  ;;  %v1247_v9 = vadd.f32 %v1231_v32, %v1195_v21  ;;  %v3118_v57 = vld [vmem:[#allocation2 + $0x98] sm:$0xff]  ;;  %v3142_v32 = vld [vmem:[#allocation2 + $0xc0] sm:$0xff] }
 0x13f   : > { %v1469_v2 = vpack.c.bf16 %v1456_v59, %v1455_v52  ;;  %v1077_v11 = vmul.f32 %v3021_v55, %v2790_v51  ;;  %v1128_v54 = vmul.f32 %v3064_v17, %v2821_v19  ;;  %v1040_v0 = vadd.f32 %v1024_v61, %v972_v60  ;;  %v3148_v45 = vld [vmem:[#allocation2 + $0xc1] sm:$0xff]  ;;  %v3163_v61 = vld [vmem:[#allocation2 + $0xca] sm:$0xff] }
 0x140   : > { %v1299_v3 = vadd.f32 %v1283_v35, %v1246_v6  ;;  %v1041_v4 = vadd.f32 %v1025_v62, %v973_v42  ;;  %v1129_v5 = vmul.f32 %v3066_v23, %v2821_v19  ;;  %v1300_v8 = vadd.f32 %v1284_v44, %v1247_v9  ;;  %v3158_v59 = vld [vmem:[#allocation2 + $0xc2] sm:$0xff]  ;;  %v3172_v9 = vld [vmem:[#allocation2 + $0xd8] sm:$0xff] }
 0x141   : > { %v1485_v7 = vsel %vm848_vm2, %v1469_v2, 0  ;;  %v1180_v26 = vmul.f32 %v3075_v25, %v2824_v20  ;;  %v1181_v55 = vmul.f32 %v3077_v56, %v2824_v20  ;;  %v1092_v30 = vadd.f32 %v1076_v41, %v1040_v0  ;;  %3778 = vst [vmem:[#allocation6_spill] sm:$0xff] %v3172_v9 }
 0x142   : > { %2335 = vmatpush3.bf16.xpose.msra.mxu1 %v1485_v7  ;;  %v1351_v10 = vadd.f32 %v1335_v47, %v1299_v3  ;;  %v1093_v12 = vadd.f32 %v1077_v11, %v1041_v4  ;;  %v1232_v16 = vmul.f32 %v3084_v33, %v2826_v28  ;;  %v1352_v34 = vadd.f32 %v1336_v50, %v1300_v8  ;;  %v3150_v47 = vld [vmem:[#allocation2 + $0xc9] sm:$0xff]  ;;  %v3176_v4 = vld [vmem:[#allocation2 + $0xe0] sm:$0xff] }
 0x143   : > { %2336 = vmatprep.subr.bf16.mxu1 %v3766_v18  ;;  %v1233_v48 = vmul.f32 %v3086_v22, %v2826_v28  ;;  %v1285_v27 = vmul.f32 %v2814_v14, %v3116_v43  ;;  %v1286_v29 = vmul.f32 %v2814_v14, %v3118_v57  ;;  %v1144_v39 = vadd.f32 %v1128_v54, %v1092_v30 }
 0x144   : > { %v1403_v24 = vadd.f32 %v1387_v40, %v1351_v10  ;;  %v1145_v35 = vadd.f32 %v1129_v5, %v1093_v12  ;;  %v1337_v44 = vmul.f32 %v2817_v15, %v3125_v58  ;;  %v1404_v50 = vadd.f32 %v1388_v49, %v1352_v34  ;;  %3779 = vst [vmem:[#allocation7_spill] sm:$0xff] %v3176_v4  ;;  %v3182_v10 = vld [vmem:[#allocation2 + $0xe1] sm:$0xff] }
 0x145   : > { %v1338_v52 = vmul.f32 %v2817_v15, %v3129_v63  ;;  %v1389_v53 = vmul.f32 %v2832_v38, %v3131_v13  ;;  %v1390_v40 = vmul.f32 %v2832_v38, %v3133_v46  ;;  %v1196_v60 = vadd.f32 %v1180_v26, %v1144_v39  ;;  %3781 = vst [vmem:[#allocation9_spill] sm:$0xff] %v3182_v10 }
 0x146   : > { %v1425_v21 = vadd.f32 %v2898_v1, %v1403_v24  ;;  %v1197_v42 = vadd.f32 %v1181_v55, %v1145_v35  ;;  %v1574_v6 = vmul.f32 %v3142_v32, %v2777_v31  ;;  %v1426_v49 = vadd.f32 %v2898_v1, %v1404_v50  ;;  %v3180_v55 = vld [vmem:[#allocation2 + $0xd9] sm:$0xff] }
 0x147   : > { %v1575_v62 = vmul.f32 %v3146_v37, %v2777_v31  ;;  %v1622_v41 = vmul.f32 %v3148_v45, %v2782_v36  ;;  %v1623_v2 = vmul.f32 %v3150_v47, %v2782_v36  ;;  %v1248_v54 = vadd.f32 %v1232_v16, %v1196_v60  ;;  %3780 = vst [vmem:[#allocation8_spill] sm:$0xff] %v3180_v55  ;;  %v3192_v60 = vld [vmem:[#allocation2 + $0xf0] sm:$0xff] }
 0x148   : > { %v1441_v11 = vmax.f32 %v1425_v21, 0.0  ;;  %v1249_v3 = vadd.f32 %v1233_v48, %v1197_v42  ;;  %v1670_v0 = vmul.f32 %v3158_v59, %v2790_v51  ;;  %v1442_v5 = vmax.f32 %v1426_v49, 0.0  ;;  %v3186_v48 = vld [vmem:[#allocation2 + $0xda] sm:$0xff]  ;;  %v3190_v21 = vld [vmem:[#allocation2 + $0xe2] sm:$0xff] }
 0x149   : > { %v1638_v7 = vadd.f32 %v1622_v41, %v1574_v6  ;;  %v1639_v8 = vadd.f32 %v1623_v2, %v1575_v62  ;;  %v1671_v26 = vmul.f32 %v3163_v61, %v2790_v51  ;;  %v1301_v12 = vadd.f32 %v1285_v27, %v1248_v54  ;;  %3782 = vst [vmem:[#allocation10_spill] sm:$0xff] %v3186_v48  ;;  %v3198_v49 = vld [vmem:[#allocation2 + $0xf8] sm:$0xff] }
 0x14a   : > { %v1457_v30 = vmin.f32 %v1441_v11, 6.0  ;;  %v1302_v34 = vadd.f32 %v1286_v29, %v1249_v3  ;;  %v1719_v16 = vmul.f32 %v3172_v9, %v2821_v19  ;;  %v1458_v24 = vmin.f32 %v1442_v5, 6.0  ;;  %3783 = vst [vmem:[#allocation11_spill] sm:$0xff] %v3190_v21  ;;  %v3202_v54 = vld [vmem:[#allocation2 + $0xf1] sm:$0xff]  ;;  %v3204_v3 = vld [vmem:[#allocation2 + $0xf9] sm:$0xff] }
 0x14b   : > { %v1686_v39 = vadd.f32 %v1670_v0, %v1638_v7  ;;  %v1687_v35 = vadd.f32 %v1671_v26, %v1639_v8  ;;  %v1720_v50 = vmul.f32 %v3176_v4, %v2821_v19  ;;  %v1353_v42 = vadd.f32 %v1337_v44, %v1301_v12  ;;  %v3210_v7 = vld [vmem:[#allocation2 + $0xf2] sm:$0xff]  ;;  %v3212_v8 = vld [vmem:[#allocation2 + $0xfa] sm:$0xff] }
 0x14c   : > { %v1354_v6 = vadd.f32 %v1338_v52, %v1302_v34  ;;  %v1767_v27 = vmul.f32 %v3180_v55, %v2824_v20  ;;  %v1768_v29 = vmul.f32 %v3182_v10, %v2824_v20  ;;  %v1470_v62 = vpack.c.bf16 %v1458_v24, %v1457_v30 }
 0x14d   : > { %v1735_v41 = vadd.f32 %v1719_v16, %v1686_v39  ;;  %v1736_v2 = vadd.f32 %v1720_v50, %v1687_v35  ;;  %v1815_v11 = vmul.f32 %v3186_v48, %v2826_v28  ;;  %v1405_v44 = vadd.f32 %v1389_v53, %v1353_v42 }
 0x14e   : > { %v1406_v52 = vadd.f32 %v1390_v40, %v1354_v6  ;;  %v1816_v0 = vmul.f32 %v3190_v21, %v2826_v28  ;;  %v1864_v5 = vmul.f32 %v3192_v60, %v2814_v14  ;;  %v1488_v26 = vsel %vm848_vm2, %v1470_v62, 0 }
 0x14f   : > { %v1783_v30 = vadd.f32 %v1767_v27, %v1735_v41  ;;  %v1784_v12 = vadd.f32 %v1768_v29, %v1736_v2  ;;  %v1865_v34 = vmul.f32 %v3198_v49, %v2814_v14  ;;  %2337 = vmatpush3.bf16.xpose.msra.mxu1 %v1488_v26  ;;  %v1427_v53 = vadd.f32 %v2898_v1, %v1405_v44 }
 0x150   : > { %v1428_v40 = vadd.f32 %v2898_v1, %v1406_v52  ;;  %v1912_v16 = vmul.f32 %v3202_v54, %v2817_v15  ;;  %v1913_v24 = vmul.f32 %v3204_v3, %v2817_v15  ;;  %2338 = vmatprep.subr.bf16.mxu1 %v3766_v18  ;;  %v1960_v50 = vmul.f32 %v3210_v7, %v2832_v38 }
 0x151   : > { %v1831_v39 = vadd.f32 %v1815_v11, %v1783_v30  ;;  %v1832_v35 = vadd.f32 %v1816_v0, %v1784_v12  ;;  %v1961_v42 = vmul.f32 %v3212_v8, %v2832_v38  ;;  %v1443_v6 = vmax.f32 %v1427_v53, 0.0 }
 0x152   : > { %v1444_v27 = vmax.f32 %v1428_v40, 0.0  ;;  %v974_v29 = vmul.f32 %v3064_v17, %v2777_v31  ;;  %v975_v62 = vmul.f32 %v3066_v23, %v2777_v31  ;;  %v1026_v11 = vmul.f32 %v3075_v25, %v2782_v36  ;;  %v3246_v40 = vld [vmem:[#allocation2 + $0xa8] sm:$0xff] }
 0x153   : > { %v1880_v41 = vadd.f32 %v1864_v5, %v1831_v39  ;;  %v1881_v2 = vadd.f32 %v1865_v34, %v1832_v35  ;;  %v1027_v44 = vmul.f32 %v3077_v56, %v2782_v36  ;;  %v1459_v52 = vmin.f32 %v1443_v6, 6.0  ;;  %v3252_v6 = vld [vmem:[#allocation2 + $0xb1] sm:$0xff] }
 0x154   : > { %v1460_v0 = vmin.f32 %v1444_v27, 6.0  ;;  %v1078_v26 = vmul.f32 %v3084_v33, %v2790_v51  ;;  %v1079_v30 = vmul.f32 %v3086_v22, %v2790_v51  ;;  %v1042_v53 = vadd.f32 %v1026_v11, %v974_v29 }
 0x155   : > { %v1928_v17 = vadd.f32 %v1912_v16, %v1880_v41  ;;  %v1929_v12 = vadd.f32 %v1913_v24, %v1881_v2  ;;  %v1043_v23 = vadd.f32 %v1027_v44, %v975_v62  ;;  %v1130_v34 = vmul.f32 %v3116_v43, %v2821_v19  ;;  %v3248_v16 = vld [vmem:[#allocation2 + $0xb0] sm:$0xff] }
 0x156   : > { %v1471_v5 = vpack.c.bf16 %v1460_v0, %v1459_v52  ;;  %v1131_v25 = vmul.f32 %v3118_v57, %v2821_v19  ;;  %v1182_v56 = vmul.f32 %v3125_v58, %v2824_v20  ;;  %v1094_v35 = vadd.f32 %v1078_v26, %v1042_v53  ;;  %v3250_v24 = vld [vmem:[#allocation2 + $0xa9] sm:$0xff]  ;;  %v3265_v52 = vld [vmem:[#allocation2 + $0xb2] sm:$0xff] }
 0x157   : > { %v1976_v33 = vadd.f32 %v1960_v50, %v1928_v17  ;;  %v1977_v39 = vadd.f32 %v1961_v42, %v1929_v12  ;;  %v1095_v22 = vadd.f32 %v1079_v30, %v1043_v23  ;;  %v1183_v29 = vmul.f32 %v3129_v63, %v2824_v20  ;;  %v3263_v44 = vld [vmem:[#allocation2 + $0xaa] sm:$0xff] }
 0x158   : > { %v1491_v27 = vsel %vm848_vm2, %v1471_v5, 0  ;;  %v1234_v62 = vmul.f32 %v3131_v13, %v2826_v28  ;;  %v1235_v50 = vmul.f32 %v3133_v46, %v2826_v28  ;;  %v1146_v2 = vadd.f32 %v1130_v34, %v1094_v35 }
 0x159   : > { %2339 = vmatpush3.bf16.xpose.msra.mxu1 %v1491_v27  ;;  %v1992_v42 = vadd.f32 %v2898_v1, %v1976_v33  ;;  %v1993_v41 = vadd.f32 %v2898_v1, %v1977_v39  ;;  %v1147_v11 = vadd.f32 %v1131_v25, %v1095_v22  ;;  %v1287_v0 = vmul.f32 %v2814_v14, %v3246_v40 }
 0x15a   : > { %2340 = vmatprep.subr.bf16.mxu1 %v3766_v18  ;;  %v1288_v26 = vmul.f32 %v2814_v14, %v3248_v16  ;;  %v1339_v30 = vmul.f32 %v2817_v15, %v3250_v24  ;;  %v1340_v17 = vmul.f32 %v2817_v15, %v3252_v6  ;;  %v1198_v23 = vadd.f32 %v1182_v56, %v1146_v2 }
 0x15b   : > { %v2008_v12 = vmax.f32 %v1992_v42, 0.0  ;;  %v2009_v53 = vmax.f32 %v1993_v41, 0.0  ;;  %v1199_v5 = vadd.f32 %v1183_v29, %v1147_v11  ;;  %v1391_v34 = vmul.f32 %v2832_v38, %v3263_v44 }
 0x15c   : > { %v1392_v25 = vmul.f32 %v2832_v38, %v3265_v52  ;;  %v1576_v33 = vmul.f32 %v3172_v9, %v2777_v31  ;;  %v1577_v39 = vmul.f32 %v3176_v4, %v2777_v31  ;;  %v1250_v27 = vadd.f32 %v1234_v62, %v1198_v23 }
 0x15d   : > { %v2024_v35 = vmin.f32 %v2008_v12, 6.0  ;;  %v2025_v22 = vmin.f32 %v2009_v53, 6.0  ;;  %v1251_v18 = vadd.f32 %v1235_v50, %v1199_v5  ;;  %v1624_v56 = vmul.f32 %v3180_v55, %v2782_v36 }
 0x15e   : > { %v1625_v29 = vmul.f32 %v3182_v10, %v2782_v36  ;;  %v1672_v42 = vmul.f32 %v3186_v48, %v2790_v51  ;;  %v1673_v41 = vmul.f32 %v3190_v21, %v2790_v51  ;;  %v1303_v11 = vadd.f32 %v1287_v0, %v1250_v27  ;;  %v3309_v27 = vld [vmem:[#allocation2 + $0x112] sm:$0xff] }
 0x15f   : > { %v2040_v2 = vpack.c.bf16 %v2025_v22, %v2024_v35  ;;  %v1304_v9 = vadd.f32 %v1288_v26, %v1251_v18  ;;  %v1721_v12 = vmul.f32 %v3192_v60, %v2821_v19  ;;  %v1640_v62 = vadd.f32 %v1624_v56, %v1576_v33  ;;  %v3307_v22 = vld [vmem:[#allocation2 + $0x110] sm:$0xff] }
 0x160   : > { %v1641_v50 = vadd.f32 %v1625_v29, %v1577_v39  ;;  %v1722_v53 = vmul.f32 %v3198_v49, %v2821_v19  ;;  %v1769_v23 = vmul.f32 %v3202_v54, %v2824_v20  ;;  %v1355_v48 = vadd.f32 %v1339_v30, %v1303_v11  ;;  %v3305_v39 = vld [vmem:[#allocation2 + $0x108] sm:$0xff] }
 0x161   : > { %v2049_v5 = vsel %vm848_vm2, %v2040_v2, 0  ;;  %v1356_v10 = vadd.f32 %v1340_v17, %v1304_v9  ;;  %v1770_v35 = vmul.f32 %v3204_v3, %v2824_v20  ;;  %v1688_v18 = vadd.f32 %v1672_v42, %v1640_v62  ;;  %v3316_v42 = vld [vmem:[#allocation2 + $0x109] sm:$0xff] }
 0x162   : > { %2351 = vmatpush3.bf16.xpose.msra.mxu0 %v2049_v5  ;;  %v1689_v0 = vadd.f32 %v1673_v41, %v1641_v50  ;;  %v1817_v26 = vmul.f32 %v3210_v7, %v2826_v28  ;;  %v1818_v33 = vmul.f32 %v3212_v8, %v2826_v28  ;;  %v3784_v30 = vmov 0.0   ;;  %v3318_v41 = vld [vmem:[#allocation2 + $0x111] sm:$0xff] }
 0x163   : > { %2352 = vmatprep.subr.bf16.mxu0 %v3784_v30  ;;  %v1407_v9 = vadd.f32 %v1391_v34, %v1355_v48  ;;  %v1408_v17 = vadd.f32 %v1392_v25, %v1356_v10  ;;  %v1866_v56 = vmul.f32 %v3305_v39, %v2814_v14  ;;  %v1867_v29 = vmul.f32 %v3307_v22, %v2814_v14  ;;  %v3324_v48 = vld [vmem:[#allocation2 + $0x10a] sm:$0xff] }
 0x164   : > { %v1737_v2 = vadd.f32 %v1721_v12, %v1688_v18  ;;  %v1738_v11 = vadd.f32 %v1722_v53, %v1689_v0  ;;  %v1914_v62 = vmul.f32 %v3316_v42, %v2817_v15  ;;  %v1915_v50 = vmul.f32 %v3318_v41, %v2817_v15  ;;  %3785 = vst [vmem:[#allocation12_spill] sm:$0xff] %v3324_v48 }
 0x165   : > { %v1429_v10 = vadd.f32 %v2898_v1, %v1407_v9  ;;  %v1430_v34 = vadd.f32 %v2898_v1, %v1408_v17  ;;  %v1962_v25 = vmul.f32 %v3324_v48, %v2832_v38  ;;  %v1963_v5 = vmul.f32 %v3309_v27, %v2832_v38  ;;  %2346 = vmatprep.mubr.msk.bf16.mxu1 %vm2496_vm4, %v3784_v30 }
 0x166   : > { %v1785_v12 = vadd.f32 %v1769_v23, %v1737_v2  ;;  %v1786_v53 = vadd.f32 %v1770_v35, %v1738_v11  ;;  %v976_v18 = vmul.f32 %v3116_v43, %v2777_v31  ;;  %v977_v0 = vmul.f32 %v3118_v57, %v2777_v31  ;;  %2366 = vmatprep.mubr.msk.bf16.mxu0 %vm2496_vm4, %v3784_v30 }
 0x167   : > { %v1445_v21 = vmax.f32 %v1429_v10, 0.0  ;;  %v1446_v55 = vmax.f32 %v1430_v34, 0.0  ;;  %v1028_v9 = vmul.f32 %v3125_v58, %v2782_v36  ;;  %v1029_v17 = vmul.f32 %v3129_v63, %v2782_v36 }
 0x168   : > { %v1833_v4 = vadd.f32 %v1817_v26, %v1785_v12  ;;  %v1834_v48 = vadd.f32 %v1818_v33, %v1786_v53  ;;  %v1080_v23 = vmul.f32 %v3131_v13, %v2790_v51  ;;  %v1081_v35 = vmul.f32 %v3133_v46, %v2790_v51 }
 0x169   : > { %v1461_v43 = vmin.f32 %v1445_v21, 6.0  ;;  %v1462_v2 = vmin.f32 %v1446_v55, 6.0  ;;  %v1044_v11 = vadd.f32 %v1028_v9, %v976_v18  ;;  %v1045_v57 = vadd.f32 %v1029_v17, %v977_v0 }
 0x16a   : > { %v1882_v10 = vadd.f32 %v1866_v56, %v1833_v4  ;;  %v1883_v34 = vadd.f32 %v1867_v29, %v1834_v48  ;;  %v1132_v58 = vmul.f32 %v3246_v40, %v2821_v19  ;;  %v1133_v63 = vmul.f32 %v3248_v16, %v2821_v19 }
 0x16b   : > { %v1472_v26 = vpack.c.bf16 %v1462_v2, %v1461_v43  ;;  %v1096_v33 = vadd.f32 %v1080_v23, %v1044_v11  ;;  %v1097_v12 = vadd.f32 %v1081_v35, %v1045_v57  ;;  %v1184_v13 = vmul.f32 %v3250_v24, %v2824_v20 }
 0x16c   : > { %v1930_v53 = vadd.f32 %v1914_v62, %v1882_v10  ;;  %v1931_v46 = vadd.f32 %v1915_v50, %v1883_v34  ;;  %v1185_v55 = vmul.f32 %v3252_v6, %v2824_v20  ;;  %v1236_v4 = vmul.f32 %v3263_v44, %v2826_v28 }
 0x16d   : > { %v1494_v21 = vsel %vm848_vm2, %v1472_v26, 0  ;;  %v1148_v56 = vadd.f32 %v1132_v58, %v1096_v33  ;;  %v1149_v29 = vadd.f32 %v1133_v63, %v1097_v12  ;;  %v1237_v48 = vmul.f32 %v3265_v52, %v2826_v28 }
 0x16e   : > { %2341 = vmatpush3.bf16.xpose.msra.mxu1 %v1494_v21  ;;  %v1978_v18 = vadd.f32 %v1962_v25, %v1930_v53  ;;  %v1979_v0 = vadd.f32 %v1963_v5, %v1931_v46  ;;  %v1289_v62 = vmul.f32 %v3142_v32, %v2814_v14  ;;  %v1290_v50 = vmul.f32 %v3146_v37, %v2814_v14 }
 0x16f   : > { %2342 = vmatprep.subr.bf16.mxu1 %v3784_v30  ;;  %v1200_v9 = vadd.f32 %v1184_v13, %v1148_v56  ;;  %v1201_v17 = vadd.f32 %v1185_v55, %v1149_v29  ;;  %v1341_v23 = vmul.f32 %v3148_v45, %v2817_v15  ;;  %v1342_v35 = vmul.f32 %v3150_v47, %v2817_v15 }
 0x170   : > { %v1994_v43 = vadd.f32 %v2898_v1, %v1978_v18  ;;  %v1995_v25 = vadd.f32 %v2898_v1, %v1979_v0  ;;  %v1393_v5 = vmul.f32 %v3158_v59, %v2832_v38  ;;  %v1394_v2 = vmul.f32 %v3163_v61, %v2832_v38 }
 0x171   : > { %v1252_v11 = vadd.f32 %v1236_v4, %v1200_v9  ;;  %v1253_v57 = vadd.f32 %v1237_v48, %v1201_v17  ;;  %v1578_v10 = vmul.f32 %v3192_v60, %v2777_v31  ;;  %v1579_v34 = vmul.f32 %v3198_v49, %v2777_v31  ;;  %v3394_v9 = vld [vmem:[#allocation2 + $0x120] sm:$0xff] }
 0x172   : > { %v2010_v58 = vmax.f32 %v1994_v43, 0.0  ;;  %v2011_v63 = vmax.f32 %v1995_v25, 0.0  ;;  %v1626_v26 = vmul.f32 %v3202_v54, %v2782_v36  ;;  %v1627_v1 = vmul.f32 %v3204_v3, %v2782_v36  ;;  %v3399_v25 = vld [vmem:[#allocation2 + $0x128] sm:$0xff] }
 0x173   : > { %v1305_v33 = vadd.f32 %v1289_v62, %v1252_v11  ;;  %v1306_v12 = vadd.f32 %v1290_v50, %v1253_v57  ;;  %v1674_v13 = vmul.f32 %v3210_v7, %v2790_v51  ;;  %v1675_v53 = vmul.f32 %v3212_v8, %v2790_v51  ;;  %v3786_v62 = vld [vmem:[#allocation12_spill] sm:$0xff]  ;;  %v3401_v11 = vld [vmem:[#allocation2 + $0x122] sm:$0xff] }
 0x174   : > { %v2026_v60 = vmin.f32 %v2010_v58, 6.0  ;;  %v2027_v46 = vmin.f32 %v2011_v63, 6.0  ;;  %v1642_v55 = vadd.f32 %v1626_v26, %v1578_v10  ;;  %v1643_v49 = vadd.f32 %v1627_v1, %v1579_v34  ;;  %v3416_v63 = vld [vmem:[#allocation2 + $0x121] sm:$0xff]  ;;  %v3418_v26 = vld [vmem:[#allocation2 + $0x129] sm:$0xff] }
 0x175   : > { %v1357_v4 = vadd.f32 %v1341_v23, %v1305_v33  ;;  %v1358_v21 = vadd.f32 %v1342_v35, %v1306_v12  ;;  %v1723_v54 = vmul.f32 %v3305_v39, %v2821_v19  ;;  %v1724_v3 = vmul.f32 %v3307_v22, %v2821_v19 }
 0x176   : > { %v2041_v56 = vpack.c.bf16 %v2027_v46, %v2026_v60  ;;  %v1690_v29 = vadd.f32 %v1674_v13, %v1642_v55  ;;  %v1691_v48 = vadd.f32 %v1675_v53, %v1643_v49  ;;  %v1771_v7 = vmul.f32 %v3316_v42, %v2824_v20 }
 0x177   : > { %v1409_v18 = vadd.f32 %v1393_v5, %v1357_v4  ;;  %v1410_v8 = vadd.f32 %v1394_v2, %v1358_v21  ;;  %v1772_v0 = vmul.f32 %v3318_v41, %v2824_v20  ;;  %v1819_v50 = vmul.f32 %v3786_v62, %v2826_v28  ;;  %v3403_v5 = vld [vmem:[#allocation2 + $0x12a] sm:$0xff]  ;;  %v3408_v2 = vld [vmem:[%s3760_s5] ss:$0 sm:$0xff] }
 0x178   : > { %v2052_v17 = vsel %vm848_vm2, %v2041_v56, 0  ;;  %v1739_v23 = vadd.f32 %v1723_v54, %v1690_v29  ;;  %v1740_v35 = vadd.f32 %v1724_v3, %v1691_v48  ;;  %v1820_v43 = vmul.f32 %v3309_v27, %v2826_v28 }
 0x179   : > { %2353 = vmatpush3.bf16.xpose.msra.mxu0 %v2052_v17  ;;  %v1431_v57 = vadd.f32 %v3408_v2, %v1409_v18  ;;  %v1432_v10 = vadd.f32 %v3408_v2, %v1410_v8  ;;  %v1868_v34 = vmul.f32 %v3394_v9, %v2814_v14  ;;  %v1869_v58 = vmul.f32 %v3399_v25, %v2814_v14 }
 0x17a   : > { %2354 = vmatprep.subr.bf16.mxu0 %v3784_v30  ;;  %v1787_v1 = vadd.f32 %v1771_v7, %v1739_v23  ;;  %v1788_v33 = vadd.f32 %v1772_v0, %v1740_v35  ;;  %v1916_v12 = vmul.f32 %v3416_v63, %v2817_v15  ;;  %v1917_v13 = vmul.f32 %v3418_v26, %v2817_v15 }
 0x17b   : > { %v1447_v53 = vmax.f32 %v1431_v57, 0.0  ;;  %v1448_v60 = vmax.f32 %v1432_v10, 0.0  ;;  %v1964_v46 = vmul.f32 %v3401_v11, %v2832_v38  ;;  %v1965_v55 = vmul.f32 %v3403_v5, %v2832_v38 }
 0x17c   : > { %v1835_v49 = vadd.f32 %v1819_v50, %v1787_v1  ;;  %v1836_v4 = vadd.f32 %v1820_v43, %v1788_v33  ;;  %v978_v21 = vmul.f32 %v3246_v40, %v2777_v31  ;;  %v979_v54 = vmul.f32 %v3248_v16, %v2777_v31  ;;  %v3787_v1 = vld [vmem:[#allocation6_spill] sm:$0xff] }
 0x17d   : > { %v1463_v3 = vmin.f32 %v1447_v53, 6.0  ;;  %v1464_v56 = vmin.f32 %v1448_v60, 6.0  ;;  %v1030_v29 = vmul.f32 %v3250_v24, %v2782_v36  ;;  %v1031_v48 = vmul.f32 %v3252_v6, %v2782_v36  ;;  %v3789_v60 = vld [vmem:[#allocation8_spill] sm:$0xff] }
 0x17e   : > { %v1884_v7 = vadd.f32 %v1868_v34, %v1835_v49  ;;  %v1885_v18 = vadd.f32 %v1869_v58, %v1836_v4  ;;  %v1082_v8 = vmul.f32 %v3263_v44, %v2790_v51  ;;  %v1083_v0 = vmul.f32 %v3265_v52, %v2790_v51  ;;  %v3791_v4 = vld [vmem:[#allocation10_spill] sm:$0xff] }
 0x17f   : > { %v1473_v40 = vpack.c.bf16 %v1464_v56, %v1463_v3  ;;  %v1046_v50 = vadd.f32 %v1030_v29, %v978_v21  ;;  %v1047_v17 = vadd.f32 %v1031_v48, %v979_v54  ;;  %v1134_v16 = vmul.f32 %v3142_v32, %v2821_v19  ;;  %v3792_v54 = vld [vmem:[#allocation11_spill] sm:$0xff] }
 0x180   : > { %v1932_v23 = vadd.f32 %v1916_v12, %v1884_v7  ;;  %v1933_v35 = vadd.f32 %v1917_v13, %v1885_v18  ;;  %v1135_v24 = vmul.f32 %v3146_v37, %v2821_v19  ;;  %v1186_v6 = vmul.f32 %v3148_v45, %v2824_v20  ;;  %v3788_v12 = vld [vmem:[#allocation7_spill] sm:$0xff] }
 0x181   : > { %v1497_v43 = vsel %vm848_vm2, %v1473_v40, 0  ;;  %v1098_v44 = vadd.f32 %v1082_v8, %v1046_v50  ;;  %v1099_v57 = vadd.f32 %v1083_v0, %v1047_v17  ;;  %v1187_v52 = vmul.f32 %v3150_v47, %v2824_v20 }
 0x182   : > { %2343 = vmatpush3.bf16.xpose.msra.mxu1 %v1497_v43  ;;  %v1980_v10 = vadd.f32 %v1964_v46, %v1932_v23  ;;  %v1981_v34 = vadd.f32 %v1965_v55, %v1933_v35  ;;  %v1238_v32 = vmul.f32 %v3158_v59, %v2826_v28  ;;  %v1239_v58 = vmul.f32 %v3163_v61, %v2826_v28  ;;  %v3790_v46 = vld [vmem:[#allocation9_spill] sm:$0xff] }
 0x183   : > { %2344 = vmatprep.subr.bf16.mxu1 %v3784_v30  ;;  %v1150_v37 = vadd.f32 %v1134_v16, %v1098_v44  ;;  %v1151_v45 = vadd.f32 %v1135_v24, %v1099_v57  ;;  %v1291_v33 = vmul.f32 %v3787_v1, %v2814_v14  ;;  %v1292_v13 = vmul.f32 %v3788_v12, %v2814_v14  ;;  %v3496_v12 = vld [vmem:[#allocation2 + $0x140] sm:$0xff] }
 0x184   : > { %v1996_v47 = vadd.f32 %v3408_v2, %v1980_v10  ;;  %v1997_v53 = vadd.f32 %v3408_v2, %v1981_v34  ;;  %v1343_v59 = vmul.f32 %v3789_v60, %v2817_v15  ;;  %v1344_v61 = vmul.f32 %v3790_v46, %v2817_v15 }
 0x185   : > { %v1202_v55 = vadd.f32 %v1186_v6, %v1150_v37  ;;  %v1203_v49 = vadd.f32 %v1187_v52, %v1151_v45  ;;  %v1395_v21 = vmul.f32 %v3791_v4, %v2832_v38  ;;  %v1396_v3 = vmul.f32 %v3792_v54, %v2832_v38  ;;  %v3515_v54 = vld [vmem:[#allocation2 + $0x142] sm:$0xff] }
 0x186   : > { %v2012_v56 = vmax.f32 %v1996_v47, 0.0  ;;  %v2013_v29 = vmax.f32 %v1997_v53, 0.0  ;;  %v1580_v48 = vmul.f32 %v3305_v39, %v2777_v31  ;;  %v1581_v7 = vmul.f32 %v3307_v22, %v2777_v31  ;;  %v3500_v47 = vld [vmem:[#allocation2 + $0x141] sm:$0xff] }
 0x187   : > { %v1254_v18 = vadd.f32 %v1238_v32, %v1202_v55  ;;  %v1255_v8 = vadd.f32 %v1239_v58, %v1203_v49  ;;  %v1628_v0 = vmul.f32 %v3316_v42, %v2782_v36  ;;  %v1629_v40 = vmul.f32 %v3318_v41, %v2782_v36  ;;  %v3494_v58 = vld [vmem:[#allocation2 + $0x138] sm:$0xff] }
 0x188   : > { %v2028_v50 = vmin.f32 %v2012_v56, 6.0  ;;  %v2029_v17 = vmin.f32 %v2013_v29, 6.0  ;;  %v1676_v16 = vmul.f32 %v3786_v62, %v2790_v51  ;;  %v1677_v23 = vmul.f32 %v3309_v27, %v2790_v51 }
 0x189   : > { %v1307_v39 = vadd.f32 %v1291_v33, %v1254_v18  ;;  %v1308_v35 = vadd.f32 %v1292_v13, %v1255_v8  ;;  %v1644_v24 = vadd.f32 %v1628_v0, %v1580_v48  ;;  %v1645_v22 = vadd.f32 %v1629_v40, %v1581_v7  ;;  %v3498_v13 = vld [vmem:[#allocation2 + $0x139] sm:$0xff] }
 0x18a   : > { %v2042_v6 = vpack.c.bf16 %v2029_v17, %v2028_v50  ;;  %v1725_v43 = vmul.f32 %v3394_v9, %v2821_v19  ;;  %v1726_v42 = vmul.f32 %v3399_v25, %v2821_v19  ;;  %v1773_v41 = vmul.f32 %v3416_v63, %v2824_v20 }
 0x18b   : > { %v1359_v44 = vadd.f32 %v1343_v59, %v1307_v39  ;;  %v1360_v57 = vadd.f32 %v1344_v61, %v1308_v35  ;;  %v1692_v62 = vadd.f32 %v1676_v16, %v1644_v24  ;;  %v1693_v52 = vadd.f32 %v1677_v23, %v1645_v22 }
 0x18c   : > { %v2055_v27 = vsel %vm848_vm2, %v2042_v6, 0  ;;  %v1774_v10 = vmul.f32 %v3418_v26, %v2824_v20  ;;  %v1821_v34 = vmul.f32 %v3401_v11, %v2826_v28  ;;  %v1822_v32 = vmul.f32 %v3403_v5, %v2826_v28 }
 0x18d   : > { %2355 = vmatpush3.bf16.xpose.msra.mxu0 %v2055_v27  ;;  %v1411_v37 = vadd.f32 %v1395_v21, %v1359_v44  ;;  %v1412_v45 = vadd.f32 %v1396_v3, %v1360_v57  ;;  %v1741_v1 = vadd.f32 %v1725_v43, %v1692_v62  ;;  %v1742_v33 = vadd.f32 %v1726_v42, %v1693_v52  ;;  %v3513_v21 = vld [vmem:[#allocation2 + $0x13a] sm:$0xff]  ;;  %v3539_v42 = vld [vmem:[#allocation2 + $0x150] sm:$0xff] }
 0x18e   : > { %2356 = vmatprep.subr.bf16.mxu0 %v3784_v30  ;;  %v1870_v53 = vmul.f32 %v3494_v58, %v2814_v14  ;;  %v1871_v60 = vmul.f32 %v3496_v12, %v2814_v14  ;;  %v1918_v59 = vmul.f32 %v3498_v13, %v2817_v15  ;;  %v1919_v46 = vmul.f32 %v3500_v47, %v2817_v15  ;;  %v3547_v52 = vld [vmem:[#allocation2 + $0x151] sm:$0xff]  ;;  %v3549_v27 = vld [vmem:[#allocation2 + $0x159] sm:$0xff] }
 0x18f   : > { %v1433_v61 = vadd.f32 %v3408_v2, %v1411_v37  ;;  %v1434_v55 = vadd.f32 %v3408_v2, %v1412_v45  ;;  %v1789_v49 = vadd.f32 %v1773_v41, %v1741_v1  ;;  %v1790_v4 = vadd.f32 %v1774_v10, %v1742_v33  ;;  %v3554_v45 = vld [vmem:[#allocation2 + $0x152] sm:$0xff]  ;;  %v3556_v1 = vld [vmem:[#allocation2 + $0x15a] sm:$0xff] }
 0x190   : > { %v1966_v3 = vmul.f32 %v3513_v21, %v2832_v38  ;;  %v1967_v56 = vmul.f32 %v3515_v54, %v2832_v38  ;;  %v1582_v29 = vmul.f32 %v3394_v9, %v2777_v31  ;;  %v1583_v48 = vmul.f32 %v3399_v25, %v2777_v31 }
 0x191   : > { %v1449_v7 = vmax.f32 %v1433_v61, 0.0  ;;  %v1450_v18 = vmax.f32 %v1434_v55, 0.0  ;;  %v1837_v8 = vadd.f32 %v1821_v34, %v1789_v49  ;;  %v1838_v0 = vadd.f32 %v1822_v32, %v1790_v4 }
 0x192   : > { %v1630_v40 = vmul.f32 %v3416_v63, %v2782_v36  ;;  %v1631_v50 = vmul.f32 %v3418_v26, %v2782_v36  ;;  %v1678_v17 = vmul.f32 %v3401_v11, %v2790_v51  ;;  %v1679_v16 = vmul.f32 %v3403_v5, %v2790_v51  ;;  %v3541_v5 = vld [vmem:[#allocation2 + $0x158] sm:$0xff] }
 0x193   : > { %v1465_v9 = vmin.f32 %v1449_v7, 6.0  ;;  %v1466_v23 = vmin.f32 %v1450_v18, 6.0  ;;  %v1886_v39 = vadd.f32 %v1870_v53, %v1837_v8  ;;  %v1887_v25 = vadd.f32 %v1871_v60, %v1838_v0 }
 0x194   : > { %v1646_v35 = vadd.f32 %v1630_v40, %v1582_v29  ;;  %v1647_v24 = vadd.f32 %v1631_v50, %v1583_v48  ;;  %v1727_v22 = vmul.f32 %v3494_v58, %v2821_v19  ;;  %v1728_v63 = vmul.f32 %v3496_v12, %v2821_v19 }
 0x195   : > { %v1474_v6 = vpack.c.bf16 %v1466_v23, %v1465_v9  ;;  %v1934_v26 = vadd.f32 %v1918_v59, %v1886_v39  ;;  %v1935_v43 = vadd.f32 %v1919_v46, %v1887_v25  ;;  %v1775_v11 = vmul.f32 %v3498_v13, %v2824_v20 }
 0x196   : > { %v1694_v41 = vadd.f32 %v1678_v17, %v1646_v35  ;;  %v1695_v44 = vadd.f32 %v1679_v16, %v1647_v24  ;;  %v1776_v57 = vmul.f32 %v3500_v47, %v2824_v20  ;;  %v1823_v62 = vmul.f32 %v3513_v21, %v2826_v28 }
 0x197   : > { %v1500_v10 = vsel %vm848_vm2, %v1474_v6, 0  ;;  %v1982_v34 = vadd.f32 %v1966_v3, %v1934_v26  ;;  %v1983_v32 = vadd.f32 %v1967_v56, %v1935_v43  ;;  %v1824_v37 = vmul.f32 %v3515_v54, %v2826_v28  ;;  %v3592_v43 = vld [vmem:[#allocation2 + $0x170] sm:$0xff] }
 0x198   : > { %2345 = vmatpush3.bf16.xpose.msra.mxu1 %v1500_v10  ;;  %v1743_v33 = vadd.f32 %v1727_v22, %v1694_v41  ;;  %v1744_v53 = vadd.f32 %v1728_v63, %v1695_v44  ;;  %v1872_v60 = vmul.f32 %v3539_v42, %v2814_v14  ;;  %v1873_v59 = vmul.f32 %v3541_v5, %v2814_v14  ;;  %v3590_v63 = vld [vmem:[#allocation2 + $0x168] sm:$0xff]  ;;  %v3596_v41 = vld [vmem:[#allocation2 + $0x171] sm:$0xff] }
 0x199   : > { %v1998_v46 = vadd.f32 %v3408_v2, %v1982_v34  ;;  %v1999_v61 = vadd.f32 %v3408_v2, %v1983_v32  ;;  %v1920_v55 = vmul.f32 %v3547_v52, %v2817_v15  ;;  %v1921_v49 = vmul.f32 %v3549_v27, %v2817_v15 }
 0x19a   : > { %v1791_v4 = vadd.f32 %v1775_v11, %v1743_v33  ;;  %v1792_v3 = vadd.f32 %v1776_v57, %v1744_v53  ;;  %v1968_v56 = vmul.f32 %v3554_v45, %v2832_v38  ;;  %v1969_v29 = vmul.f32 %v3556_v1, %v2832_v38  ;;  %v3594_v11 = vld [vmem:[#allocation2 + $0x169] sm:$0xff] }
 0x19b   : > { %v2014_v48 = vmax.f32 %v1998_v46, 0.0  ;;  %v2015_v7 = vmax.f32 %v1999_v61, 0.0  ;;  %v1584_v18 = vmul.f32 %v3494_v58, %v2777_v31  ;;  %v1585_v8 = vmul.f32 %v3496_v12, %v2777_v31  ;;  %v3605_v53 = vld [vmem:[#allocation2 + $0x16a] sm:$0xff] }
 0x19c   : > { %v1839_v0 = vadd.f32 %v1823_v62, %v1791_v4  ;;  %v1840_v40 = vadd.f32 %v1824_v37, %v1792_v3  ;;  %v1632_v50 = vmul.f32 %v3498_v13, %v2782_v36  ;;  %v1633_v17 = vmul.f32 %v3500_v47, %v2782_v36 }
 0x19d   : > { %v2030_v16 = vmin.f32 %v2014_v48, 6.0  ;;  %v2031_v9 = vmin.f32 %v2015_v7, 6.0  ;;  %v1680_v23 = vmul.f32 %v3513_v21, %v2790_v51  ;;  %v1681_v39 = vmul.f32 %v3515_v54, %v2790_v51 }
 0x19e   : > { %v1888_v58 = vadd.f32 %v1872_v60, %v1839_v0  ;;  %v1889_v25 = vadd.f32 %v1873_v59, %v1840_v40  ;;  %v1648_v35 = vadd.f32 %v1632_v50, %v1584_v18  ;;  %v1649_v12 = vadd.f32 %v1633_v17, %v1585_v8  ;;  %v3607_v60 = vld [vmem:[#allocation2 + $0x172] sm:$0xff] }
 0x19f   : > { %v2043_v24 = vpack.c.bf16 %v2031_v9, %v2030_v16  ;;  %v1729_v22 = vmul.f32 %v3539_v42, %v2821_v19  ;;  %v1730_v13 = vmul.f32 %v3541_v5, %v2821_v19  ;;  %v1777_v47 = vmul.f32 %v3547_v52, %v2824_v20 }
 0x1a0   : > { %v1936_v21 = vadd.f32 %v1920_v55, %v1888_v58  ;;  %v1937_v6 = vadd.f32 %v1921_v49, %v1889_v25  ;;  %v1696_v26 = vadd.f32 %v1680_v23, %v1648_v35  ;;  %v1697_v54 = vadd.f32 %v1681_v39, %v1649_v12 }
 0x1a1   : > { %v2058_v44 = vsel %vm848_vm2, %v2043_v24, 0  ;;  %v1778_v57 = vmul.f32 %v3549_v27, %v2824_v20  ;;  %v1825_v62 = vmul.f32 %v3554_v45, %v2826_v28  ;;  %v1826_v10 = vmul.f32 %v3556_v1, %v2826_v28 }
 0x1a2   : > { %2357 = vmatpush3.bf16.xpose.msra.mxu0 %v2058_v44  ;;  %v1984_v34 = vadd.f32 %v1968_v56, %v1936_v21  ;;  %v1985_v32 = vadd.f32 %v1969_v29, %v1937_v6  ;;  %v1745_v37 = vadd.f32 %v1729_v22, %v1696_v26  ;;  %v1746_v33 = vadd.f32 %v1730_v13, %v1697_v54  ;;  %v1860_v13 = vld [vmem:[#allocation2 + $0x180] sm:$0xff]  ;;  %v1909_v44 = vld [vmem:[#allocation2 + $0x189] sm:$0xff] }
 0x1a3   : > { %2358 = vmatprep.subr.bf16.mxu0 %v3784_v30  ;;  %v1874_v59 = vmul.f32 %v3590_v63, %v2814_v14  ;;  %v1875_v46 = vmul.f32 %v3592_v43, %v2814_v14  ;;  %v1922_v61 = vmul.f32 %v3594_v11, %v2817_v15  ;;  %v1923_v55 = vmul.f32 %v3596_v41, %v2817_v15  ;;  %v1908_v54 = vld [vmem:[#allocation2 + $0x181] sm:$0xff] }
 0x1a4   : > { %v2000_v49 = vadd.f32 %v3408_v2, %v1984_v34  ;;  %v2001_v4 = vadd.f32 %v3408_v2, %v1985_v32  ;;  %v1793_v3 = vadd.f32 %v1777_v47, %v1745_v37  ;;  %v1794_v56 = vadd.f32 %v1778_v57, %v1746_v33  ;;  %v1956_v32 = vld [vmem:[#allocation2 + $0x182] sm:$0xff]  ;;  %v1957_v37 = vld [vmem:[#allocation2 + $0x18a] sm:$0xff] }
 0x1a5   : > { %v1970_v29 = vmul.f32 %v3605_v53, %v2832_v38  ;;  %v1971_v48 = vmul.f32 %v3607_v60, %v2832_v38  ;;  %v1586_v7 = vmul.f32 %v3539_v42, %v2777_v31  ;;  %v1587_v18 = vmul.f32 %v3541_v5, %v2777_v31 }
 0x1a6   : > { %v2016_v8 = vmax.f32 %v2000_v49, 0.0  ;;  %v2017_v0 = vmax.f32 %v2001_v4, 0.0  ;;  %v1841_v40 = vadd.f32 %v1825_v62, %v1793_v3  ;;  %v1842_v50 = vadd.f32 %v1826_v10, %v1794_v56 }
 0x1a7   : > { %v1634_v17 = vmul.f32 %v3547_v52, %v2782_v36  ;;  %v1635_v16 = vmul.f32 %v3549_v27, %v2782_v36  ;;  %v1682_v9 = vmul.f32 %v3554_v45, %v2790_v51  ;;  %v1683_v23 = vmul.f32 %v3556_v1, %v2790_v51  ;;  %v1861_v1 = vld [vmem:[#allocation2 + $0x188] sm:$0xff] }
 0x1a8   : > { %v2032_v42 = vmin.f32 %v2016_v8, 6.0  ;;  %v2033_v39 = vmin.f32 %v2017_v0, 6.0  ;;  %v1890_v58 = vadd.f32 %v1874_v59, %v1841_v40  ;;  %v1891_v5 = vadd.f32 %v1875_v46, %v1842_v50 }
 0x1a9   : > { %v1650_v25 = vadd.f32 %v1634_v17, %v1586_v7  ;;  %v1651_v35 = vadd.f32 %v1635_v16, %v1587_v18  ;;  %v1731_v12 = vmul.f32 %v3590_v63, %v2821_v19  ;;  %v1732_v52 = vmul.f32 %v3592_v43, %v2821_v19 }
 0x1aa   : > { %v2044_v24 = vpack.c.bf16 %v2033_v39, %v2032_v42  ;;  %v1938_v27 = vadd.f32 %v1922_v61, %v1890_v58  ;;  %v1939_v22 = vadd.f32 %v1923_v55, %v1891_v5  ;;  %v1779_v45 = vmul.f32 %v3594_v11, %v2824_v20 }
 0x1ab   : > { %v1698_v47 = vadd.f32 %v1682_v9, %v1650_v25  ;;  %v1699_v21 = vadd.f32 %v1683_v23, %v1651_v35  ;;  %v1780_v6 = vmul.f32 %v3596_v41, %v2824_v20  ;;  %v1827_v26 = vmul.f32 %v3605_v53, %v2826_v28 }
 0x1ac   : > { %v2061_v57 = vsel %vm848_vm2, %v2044_v24, 0  ;;  %v1986_v62 = vadd.f32 %v1970_v29, %v1938_v27  ;;  %v1987_v10 = vadd.f32 %v1971_v48, %v1939_v22  ;;  %v1828_v34 = vmul.f32 %v3607_v60, %v2826_v28  ;;  %v1862_v27 = vld [vmem:[#allocation2 + $0x198] sm:$0xff] }
 0x1ad   : > { %2359 = vmatpush3.bf16.xpose.msra.mxu0 %v2061_v57  ;;  %v1747_v33 = vadd.f32 %v1731_v12, %v1698_v47  ;;  %v1748_v59 = vadd.f32 %v1732_v52, %v1699_v21  ;;  %v1876_v46 = vmul.f32 %v1860_v13, %v2814_v14  ;;  %v1877_v61 = vmul.f32 %v1861_v1, %v2814_v14  ;;  %v1910_v21 = vld [vmem:[#allocation2 + $0x199] sm:$0xff] }
 0x1ae   : > { %2360 = vmatprep.subr.bf16.mxu0 %v3784_v30  ;;  %v2002_v55 = vadd.f32 %v3408_v2, %v1986_v62  ;;  %v2003_v49 = vadd.f32 %v3408_v2, %v1987_v10  ;;  %v1924_v4 = vmul.f32 %v1908_v54, %v2817_v15  ;;  %v1925_v3 = vmul.f32 %v1909_v44, %v2817_v15  ;;  %v1959_v10 = vld [vmem:[#allocation2 + $0x1a2] sm:$0xff] }
 0x1af   : > { %v1795_v56 = vadd.f32 %v1779_v45, %v1747_v33  ;;  %v1796_v29 = vadd.f32 %v1780_v6, %v1748_v59  ;;  %v1972_v48 = vmul.f32 %v1956_v32, %v2832_v38  ;;  %v1973_v7 = vmul.f32 %v1957_v37, %v2832_v38  ;;  %v1911_v6 = vld [vmem:[#allocation2 + $0x1a1] sm:$0xff] }
 0x1b0   : > { %v2018_v18 = vmax.f32 %v2002_v55, 0.0  ;;  %v2019_v8 = vmax.f32 %v2003_v49, 0.0  ;;  %v1588_v0 = vmul.f32 %v3590_v63, %v2777_v31  ;;  %v1589_v40 = vmul.f32 %v3592_v43, %v2777_v31 }
 0x1b1   : > { %v1843_v50 = vadd.f32 %v1827_v26, %v1795_v56  ;;  %v1844_v17 = vadd.f32 %v1828_v34, %v1796_v29  ;;  %v1636_v16 = vmul.f32 %v3594_v11, %v2782_v36  ;;  %v1637_v9 = vmul.f32 %v3596_v41, %v2782_v36  ;;  %v941_v34 = vld [vmem:[%s3761_s6] sm:$0x3] }
 0x1b2   : > { %v2034_v23 = vmin.f32 %v2018_v18, 6.0  ;;  %v2035_v42 = vmin.f32 %v2019_v8, 6.0  ;;  %v1684_v39 = vmul.f32 %v3605_v53, %v2790_v51  ;;  %v1685_v58 = vmul.f32 %v3607_v60, %v2790_v51  ;;  %v1863_v53 = vld [vmem:[#allocation2 + $0x1a0] sm:$0xff]  ;;  %2347 = vmatmul.mubr.msk.bf16.vlgmr.msra.gmra.mrb[0].mxu1 %vm848_vm2, %v941_v34 }
 0x1b3   : > { %v1892_v63 = vadd.f32 %v1876_v46, %v1843_v50  ;;  %v1893_v5 = vadd.f32 %v1877_v61, %v1844_v17  ;;  %v1652_v25 = vadd.f32 %v1636_v16, %v1588_v0  ;;  %v1653_v31 = vadd.f32 %v1637_v9, %v1589_v40 }
 0x1b4   : > { %v2045_v43 = vpack.c.bf16 %v2035_v42, %v2034_v23  ;;  %v1733_v35 = vmul.f32 %v1860_v13, %v2821_v19  ;;  %v1734_v11 = vmul.f32 %v1861_v1, %v2821_v19  ;;  %v1781_v12 = vmul.f32 %v1908_v54, %v2824_v20 }
 0x1b5   : > { %v1940_v36 = vadd.f32 %v1924_v4, %v1892_v63  ;;  %v1941_v41 = vadd.f32 %v1925_v3, %v1893_v5  ;;  %v1700_v52 = vadd.f32 %v1684_v39, %v1652_v25  ;;  %v1701_v24 = vadd.f32 %v1685_v58, %v1653_v31  ;;  %v1554_v31 = vld [vmem:[%s377_s25] sm:$0xf] }
 0x1b6   : > { %v2064_v22 = vsel %vm848_vm2, %v2045_v43, 0  ;;  %v1782_v51 = vmul.f32 %v1909_v44, %v2824_v20  ;;  %v1829_v60 = vmul.f32 %v1956_v32, %v2826_v28  ;;  %v1830_v45 = vmul.f32 %v1957_v37, %v2826_v28  ;;  %v1958_v28 = vld [vmem:[#allocation2 + $0x19a] sm:$0xff] }
 0x1b7   : > { %2361 = vmatpush3.bf16.xpose.msra.mxu0 %v2064_v22  ;;  %v1988_v13 = vadd.f32 %v1972_v48, %v1940_v36  ;;  %v1989_v47 = vadd.f32 %v1973_v7, %v1941_v41  ;;  %v1749_v19 = vadd.f32 %v1733_v35, %v1700_v52  ;;  %v1750_v1 = vadd.f32 %v1734_v11, %v1701_v24  ;;  %v943_v48 = vld [vmem:[%s3763_s8] sm:$0xf]  ;;  %v2251_v24 = vld [vmem:[%s377_s25 + $0x4] sm:$0xf]  ;;  %s2435_s25 = sshll.u32 %s2498_s17, 4  ;;  %s2436_s25 = int_to_ptr.vmem [resolvable:$false] %s2435_s25 }
 0x1b8   : > { %2362 = vmatprep.subr.bf16.mxu0 %v3784_v30  ;;  %v1878_v26 = vmul.f32 %v1862_v27, %v2814_v14  ;;  %v1879_v54 = vmul.f32 %v1863_v53, %v2814_v14  ;;  %v1926_v32 = vmul.f32 %v1910_v21, %v2817_v15  ;;  %v1927_v37 = vmul.f32 %v1911_v6, %v2817_v15  ;;  %v942_v14 = vld [vmem:[%s3762_s7] sm:$0xf]  ;;  %s2437_s26 = scalar_lea.vmem %s2436_s25, 256  ;;  %p2438_p0 = scmp.lt.s32.totalorder %s3715_s29, %s2436_s25 }
 0x1b9   : > { %v2004_v57 = vadd.f32 %v3408_v2, %v1988_v13  ;;  %v2005_v20 = vadd.f32 %v3408_v2, %v1989_v47  ;;  %v1797_v44 = vadd.f32 %v1781_v12, %v1749_v19  ;;  %v1798_v62 = vadd.f32 %v1782_v51, %v1750_v1  ;;  %p2439_p1 = scmp.lt.s32.totalorder %s2437_s26, %s2431_s21 }
 0x1ba   : > { %v1974_v55 = vmul.f32 %v1958_v28, %v2832_v38  ;;  %v1975_v49 = vmul.f32 %v1959_v10, %v2832_v38  ;;  %v2497_v15 = vmov 0  }
 0x1bb   : > { %v2020_v33 = vmax.f32 %v2004_v57, 0.0  ;;  %v2021_v59 = vmax.f32 %v2005_v20, 0.0  ;;  %v1845_v46 = vadd.f32 %v1829_v60, %v1797_v44  ;;  %v1846_v61 = vadd.f32 %v1830_v45, %v1798_v62  ;;  %2413 = vset.pattern.permute.xlu0 %v2497_v15  ;;  %p2440_p2 = por %p2439_p1, %p2438_p0 }
 0x1bc   : > { %1544 = vperm.xlu0 %2413, %v942_v14  }
 0x1bd   : > { %v2036_v4 = vmin.f32 %v2020_v33, 6.0  ;;  %v2037_v3 = vmin.f32 %v2021_v59, 6.0  ;;  %v1894_v56 = vadd.f32 %v1878_v26, %v1845_v46  ;;  %v1895_v29 = vadd.f32 %v1879_v54, %v1846_v61  ;;  %p2441_p3 = pnand %p2440_p2, %p2434_p13 }
 0x1bf   : > { %v2046_v7 = vpack.c.bf16 %v2037_v3, %v2036_v4  ;;  %v1942_v18 = vadd.f32 %v1926_v32, %v1894_v56  ;;  %v1943_v8 = vadd.f32 %v1927_v37, %v1895_v29 }
 0x1c0   : > { %1550 = vperm.xlu0 %2413, %v943_v48  }
 0x1c1   : > { %v2067_v0 = vsel %vm848_vm2, %v2046_v7, 0  ;;  %v1990_v40 = vadd.f32 %v1974_v55, %v1942_v18  ;;  %v1991_v38 = vadd.f32 %v1975_v49, %v1943_v8 }
 0x1c2   : > { %2363 = vmatpush3.bf16.xpose.msra.mxu0 %v2067_v0 }
 0x1c3   : > { %2364 = vmatprep.subr.bf16.mxu0 %v3784_v30  ;;  %v2006_v50 = vadd.f32 %v3408_v2, %v1990_v40  ;;  %v2007_v17 = vadd.f32 %v3408_v2, %v1991_v38 }
 0x1c5   : > { %v2022_v16 = vmax.f32 %v2006_v50, 0.0  ;;  %v2023_v9 = vmax.f32 %v2007_v17, 0.0 }
 0x1c7   : > { %v2038_v23 = vmin.f32 %v2022_v16, 6.0  ;;  %v2039_v42 = vmin.f32 %v2023_v9, 6.0 }
 0x1c9   : > { %v2047_v39 = vpack.c.bf16 %v2039_v42, %v2038_v23 }
 0x1cb   : > { %v2070_v58 = vsel %vm848_vm2, %v2047_v39, 0 }
 0x1cc   : > { %2365 = vmatpush3.bf16.xpose.msra.mxu0 %v2070_v58 }
 0x1d3   : > { %2367 = vmatmul.mubr.msk.bf16.vlgmr.msra.gmra.mrb[32].mxu0 %vm848_vm2, %v941_v34 }
 0x23b   : > { %v1545_v63 = vpop.permute.xlu0 %1544 }
 0x23f   : > { %v1551_v5 = vpop.permute.xlu0 %1550 }
 0x285   : > { %v1536_v30 = vpop.f32.mrb[0].mxu1 }
 0x286   : > { %v1547_v2 = vmul.f32 %v1545_v63, %v1536_v30  ;;  %v2348_v25 = vpop.f32.mrb[1].mxu1 }
 0x287   : > { %v1539_v43 = vpop.f32.mrb[2].mxu1 }
 0x288   : > { %v1553_v35 = vadd.f32 %v1551_v5, %v1547_v2  ;;  %v2349_v11 = vpop.f32.mrb[3].mxu1 }
 0x28a   : > { %v1555_v12 = vadd.f32 %v1554_v31, %v1553_v35 }
 0x28c   : > { %1556 = vst [vmem:[%s367_s28] sm:$0xf] %v1555_v12 }
 0x2a6   : > { %v2106_v36 = vpop.f32.mrb[32].mxu0 }
 0x2a7   : > { %v2112_v41 = vmul.f32 %v2106_v36, %v1545_v63  ;;  %v2368_v52 = vpop.f32.mrb[33].mxu0 }
 0x2a8   : > { %v2109_v27 = vpop.f32.mrb[34].mxu0 }
 0x2a9   : > { %v2113_v53 = vadd.f32 %v2112_v41, %v1551_v5  ;;  %v2369_v22 = vpop.f32.mrb[35].mxu0 }
 0x2ab   : > { %v2116_v51 = vadd.f32 %v2251_v24, %v2113_v53 }
 0x2ad   : > { %2252 = vst [vmem:[%s367_s28 + $0x4] sm:$0xf] %v2116_v51 }
 0x2ae   : > { %2444 = shalt.err (!%p2441_p3)
}
 0x2af   : > { %s2445_s18 = scalar_lea.hbm %s3713_s12, 128  ;;  %s2449_s30 = scalar_lea.hbm %s3765_s10, 256 }
 0x2b0   : > { %p2446_p4 = scmp.ne.s32.totalorder %s3713_s12, %s2445_s18  ;;  %p2450_p9 = scmp.lt.u32.totalorder %s3713_s12, %s3765_s10 }
 0x2b1   : > { %p2451_p10 = scmp.lt.u32.totalorder %s2449_s30, %s2445_s18  ;;  %p2453_p12 = scmp.lt.u32.totalorder %s2445_s18, %s3713_s12 }
 0x2b2   : > { %p2447_p7 = pnand %p2446_p4, %p2592_p5 }
 0x2b3   : > { %p2452_p11 = por %p2451_p10, %p2450_p9 }
 0x2b4   : > { %p2448_p8 = pneg %p2447_p7 }
 0x2b5   : > { %p2454_p13 = por %p2453_p12, %p2452_p11 }
 0x2b7   : > { %p2455_p0 = pnand %p2454_p13, %p2448_p8 }
 0x2b9   : > { %2458 = shalt.err (!%p2455_p0)
}
 0x2ba   : > { %2371 = dma.vmem_to_hbm [thread:$0]  (%p2592_p5), %s3715_s29, 128, %s3713_s12, %s2120_s20  }
 0x2bb PF: > { %p2377_p1 = scmp.ge.s32.totalorder %s2493_s16, 2  ;;  %s2146_s21 = sand.u32 1, %s2481_s13  }
 0x2bc   : > { %s2147_s25 = scalar_lea.sflag [#allocation4], %s2146_s21 }
 0x2bd   : > { %p2374_p2 = pnand %p2377_p1, %p2596_p6 }
 0x2bf   : > { %2476 = dma.done.wait (!%p2374_p2), %s2147_s25, 128  }
 0x2c0   : > { %2478 = vsyncadd (!%p2374_p2), %s2147_s25, 4294967168  ;;  %p20_p3 = scmp.ge.s32.totalorder %s2579_s19, 4   ;;  %s3793_s13 = smov %s2485_s14 }
 0x2c1   : > { %s3794_s14 = smov %s2489_s15  ;;  %s3795_s15 = smov %s2590_s22 }
 0x2c2   : > { %s3796_s16 = smov %s2579_s19  ;;  %22 = sbr.rel (!%p20_p3) target bundleno = 3 (0x3), region = 105 }
 0x2c9   :  { %2152 = vsyncpa [#allocation4], 1 }
 0x2ca   :  { %2154 = vsyncpa [#allocation4 + $0x1], 1 }

</bundles_post_ra>
